<compile_context>
chip_gen: v7x
topology: tpu7x:2x2x1
jax: 0.10.0
libtpu: 0.0.40
codegen_flags: <defaults>
</compile_context>

<pallas_src>
import functools

import jax
import jax.numpy as jnp
from jax import lax
from jax.experimental import pallas as pl
from jax.experimental.pallas import tpu as pltpu

NEG_BIG = -1e30


def _round_up(x, m):
    return ((x + m - 1) // m) * m


def _should_fuse_linears():
    """Block-diag fusion of the two linears only pays on 256-wide MXUs."""
    try:
        kind = jax.devices()[0].device_kind.lower()
    except Exception:  # pragma: no cover - defensive
        return True
    for tag in ("v2", "v3", "v4", "v5"):
        if tag in kind:
            return False
    return True


def make_gcn_kernel(n_layers, fuse_linears, fp):
    """Build a fused kernel for `n_layers` stacked GCNLayers (unrolled)."""
    n_per_layer = 5 if fuse_linears else 6

    def kernel(*refs):
        adj_ref = refs[0]                       # (N, N) bf16, adj[dst, src]
        feat_ref = refs[1]                      # (N, FP) f32 padded features
        param_refs = refs[2:2 + n_per_layer * n_layers]
        out_ref = refs[2 + n_per_layer * n_layers]
        att_refs = refs[3 + n_per_layer * n_layers:]

        adj_b = adj_ref[...]                    # bf16 {0,1} (exact)
        # Additive softmax mask: 0 on edges, -1e30 elsewhere.  Single persistent
        # (N, N) f32; replaces the boolean mask + two jnp.where of the old code.
        neg_mask = (1.0 - adj_b.astype(jnp.float32)) * NEG_BIG
        h = feat_ref[...]                       # (N, FP) f32

        for i in range(n_layers):
            p = param_refs[n_per_layer * i: n_per_layer * (i + 1)]
            if fuse_linears:
                w_big, b, bres, gamma, beta = (r[...] for r in p)
            else:
                w, b, wres_t, bres, gamma, beta = (r[...] for r in p)

            h_b = h.astype(jnp.bfloat16)

            # --- edge scores: s[dst, src] = sum_k tanh(h[dst,k]) * h[src,k] ---
            # Contract last dims of both operands (trans_b on the MXU, bf16 in,
            # f32 accumulate) -> no explicit h.T.
            s = lax.dot_general(
                jnp.tanh(h).astype(jnp.bfloat16), h_b,
                dimension_numbers=(((1,), (1,)), ((), ())),
                preferred_element_type=jnp.float32)          # (N, N) f32
            s = jnp.maximum(s, 0.2 * s)                      # LeakyReLU(0.2)

            # --- edge_softmax over incoming edges (per destination row) ---
            # Self loops guarantee >=1 edge per row, so exp() of masked entries
            # underflows to exactly 0 and denom >= 1.
            s = s + neg_mask
            row_max = jnp.max(s, axis=1, keepdims=True)
            ex = jnp.exp(s - row_max)
            denom = jnp.sum(ex, axis=1, keepdims=True)
            att_refs[i][...] = ex * pl.reciprocal(denom, approx=True)

            # --- aggregation: agg[d] = sum_{s in N_in(d)} h[s] (copy_u + sum) ---
            agg = jnp.dot(adj_b, h_b, preferred_element_type=jnp.float32)

            if fuse_linears:
                # One 2FP-wide matmul: [agg | h] @ blockdiag(W, Wres).
                lhs = jnp.concatenate([agg.astype(jnp.bfloat16), h_b], axis=1)
                full = jnp.dot(lhs, w_big, preferred_element_type=jnp.float32)
                rst = jnp.maximum(full[:, :fp] + b, 0.0)     # GraphConv + ReLU
                res = jnp.maximum(full[:, fp:] + bres, 0.0)  # residual + ReLU
            else:
                rst = jnp.dot(agg.astype(jnp.bfloat16), w,
                              preferred_element_type=jnp.float32)
                rst = jnp.maximum(rst + b, 0.0)
                res = jnp.dot(h_b, wres_t,
                              preferred_element_type=jnp.float32)
                res = jnp.maximum(res + bres, 0.0)

            new = rst + res                      # dropout p=0.0 -> identity

            # --- BatchNorm1d (training mode, biased variance), single pass ---
            mean = jnp.mean(new, axis=0, keepdims=True)
            meansq = jnp.mean(new * new, axis=0, keepdims=True)
            var = jnp.maximum(meansq - mean * mean, 0.0)
            h = (new - mean) * lax.rsqrt(var + 1e-5) * gamma + beta

        out_ref[...] = h

    return kernel


@functools.partial(jax.jit, static_argnames=("fuse_linears",))
def _gcn_forward_impl(adj, feats, *flat_params, fuse_linears):
    """Fused multi-layer GCN forward.  flat_params = 6 arrays per layer."""
    n_layers = len(flat_params) // 6
    N = feats.shape[0]

    # Uniform lane-dense feature width: pad every feature dim to a multiple of
    # 128.  Zero padding is exact for this network (tanh(0)=0, zero weight
    # rows/cols, BN of an all-zero column stays zero with gamma=1, beta=0).
    dims = [feats.shape[1]] + [flat_params[6 * i].shape[1] for i in range(n_layers)]
    FP = _round_up(max(dims + [128]), 128)

    def pad_row(x):                              # (1, f) -> (1, FP)
        return jnp.pad(x, ((0, 0), (0, FP - x.shape[1])))

    def pad_mat(x):                              # (fi, fo) -> (FP, FP)
        return jnp.pad(x, ((0, FP - x.shape[0]), (0, FP - x.shape[1])))

    feat_p = jnp.pad(feats.astype(jnp.float32),
                     ((0, 0), (0, FP - feats.shape[1])))

    padded_params = []
    for i in range(n_layers):
        w, b, wres_t, bres, gamma, beta = flat_params[6 * i: 6 * (i + 1)]
        w_p = pad_mat(w).astype(jnp.bfloat16)
        wres_p = pad_mat(wres_t).astype(jnp.bfloat16)
        if fuse_linears:
            zero = jnp.zeros((FP, FP), jnp.bfloat16)
            w_big = jnp.concatenate(
                [jnp.concatenate([w_p, zero], axis=1),
                 jnp.concatenate([zero, wres_p], axis=1)], axis=0)  # (2FP, 2FP)
            layer = [w_big]
        else:
            layer = [w_p]
        layer += [pad_row(b)]
        if not fuse_linears:
            layer += [wres_p]
        layer += [
            pad_row(bres),
            jnp.pad(gamma, ((0, 0), (0, FP - gamma.shape[1])), constant_values=1.0),
            pad_row(beta),
        ]
        padded_params += layer
    f_out_last = flat_params[6 * (n_layers - 1)].shape[1]

    vmem = pl.BlockSpec(memory_space=pltpu.MemorySpace.VMEM)
    n_per_layer = 5 if fuse_linears else 6
    out_shapes = ((jax.ShapeDtypeStruct((N, FP), jnp.float32),) +
                  tuple(jax.ShapeDtypeStruct((N, N), jnp.float32)
                        for _ in range(n_layers)))

    outs = pl.pallas_call(
        make_gcn_kernel(n_layers, fuse_linears, FP),
        out_shape=out_shapes,
        in_specs=[vmem] * (2 + n_per_layer * n_layers),
        out_specs=(vmem,) * (1 + n_layers),
        compiler_params=pltpu.CompilerParams(
            vmem_limit_bytes=32 * 1024 * 1024),
    )(adj.astype(jnp.bfloat16), feat_p, *padded_params)

    out_feats = outs[0][:, :f_out_last]          # drop lane padding
    att = tuple(outs[1:])
    return out_feats, att


def gcn_forward(adj, feats, *flat_params):
    return _gcn_forward_impl(adj, feats, *flat_params,
                             fuse_linears=_should_fuse_linears())


def init_gcn_params(key, in_feats, hidden_feats):
    """Deterministic parameter init mimicking the PyTorch module."""
    params = []
    f_in = in_feats
    for f_out in hidden_feats:
        key, k_w, k_wr, k_br = jax.random.split(key, 4)
        # GraphConv.weight: Xavier uniform (in_feats, out_feats), bias zeros.
        bound_w = (6.0 / (f_in + f_out)) ** 0.5
        w = jax.random.uniform(k_w, (f_in, f_out), jnp.float32, -bound_w, bound_w)
        b = jnp.zeros((1, f_out), jnp.float32)
        # res_connection = nn.Linear(in, out): uniform(-1/sqrt(in), 1/sqrt(in)).
        bound_l = 1.0 / (f_in ** 0.5)
        wres_t = jax.random.uniform(k_wr, (f_in, f_out), jnp.float32, -bound_l, bound_l)
        bres = jax.random.uniform(k_br, (1, f_out), jnp.float32, -bound_l, bound_l)
        # BatchNorm1d affine params.
        gamma = jnp.ones((1, f_out), jnp.float32)
        beta = jnp.zeros((1, f_out), jnp.float32)
        params.append((w, b, wres_t, bres, gamma, beta))
        f_in = f_out
    return params


if __name__ == "__main__":
    key = jax.random.PRNGKey(0)
    N = 128           # total nodes in the batch of graphs (lane-dense)
    IN_FEATS = 16
    HIDDEN_FEATS = [64, 64]   # module default

    key, k_adj, k_feat, k_param = jax.random.split(key, 4)

    # Random directed graph with self loops (avoids zero in-degree rows).
    adj = (jax.random.uniform(k_adj, (N, N)) < 0.10).astype(jnp.float32)
    adj = jnp.maximum(adj, jnp.eye(N, dtype=jnp.float32))   # adj[dst, src]

    feats = jax.random.normal(k_feat, (N, IN_FEATS), jnp.float32)

    params = init_gcn_params(k_param, IN_FEATS, HIDDEN_FEATS)
    flat_params = tuple(p for layer in params for p in layer)

    out_feats, att = gcn_forward(adj, feats, *flat_params)
    jax.block_until_ready(out_feats)
    jax.block_until_ready(att)

    assert out_feats.shape == (N, HIDDEN_FEATS[-1])
    assert len(att) == len(HIDDEN_FEATS) and att[0].shape == (N, N)
    # Sanity: each attention row (masked softmax over incoming edges) sums ~1,
    # and attention is zero exactly where there is no edge.
    row_sums = jnp.sum(att[0], axis=1)
    assert bool(jnp.all(jnp.abs(row_sums - 1.0) < 1e-2))
    assert bool(jnp.all(jnp.where(adj > 0, 0.0, att[0]) == 0.0))
    assert bool(jnp.all(jnp.isfinite(out_feats)))
    print("KERNEL_OK")
</pallas_src>

<mosaic_0001>
module attributes {stable_mosaic.version = 11 : i64} {
  func.func @kernel(%arg0: memref<128x128xbf16, #tpu.memory_space<vmem>>, %arg1: memref<128x128xf32, #tpu.memory_space<vmem>>, %arg2: memref<256x256xbf16, #tpu.memory_space<vmem>>, %arg3: memref<1x128xf32, #tpu.memory_space<vmem>>, %arg4: memref<1x128xf32, #tpu.memory_space<vmem>>, %arg5: memref<1x128xf32, #tpu.memory_space<vmem>>, %arg6: memref<1x128xf32, #tpu.memory_space<vmem>>, %arg7: memref<256x256xbf16, #tpu.memory_space<vmem>>, %arg8: memref<1x128xf32, #tpu.memory_space<vmem>>, %arg9: memref<1x128xf32, #tpu.memory_space<vmem>>, %arg10: memref<1x128xf32, #tpu.memory_space<vmem>>, %arg11: memref<1x128xf32, #tpu.memory_space<vmem>>, %arg12: memref<128x128xf32, #tpu.memory_space<vmem>>, %arg13: memref<128x128xf32, #tpu.memory_space<vmem>>, %arg14: memref<128x128xf32, #tpu.memory_space<vmem>>) attributes {dimension_semantics = [], scalar_prefetch = 0 : i64, scratch_operands = 0 : i64, tpu.core_type = #tpu.core_type<tc>} {
    %c0 = arith.constant 0 : index
    %c0_0 = arith.constant 0 : index
    %0 = vector.load %arg0[%c0, %c0_0] : memref<128x128xbf16, #tpu.memory_space<vmem>>, vector<128x128xbf16>
    %1 = arith.extf %0 : vector<128x128xbf16> to vector<128x128xf32>
    %cst = arith.constant 1.000000e+00 : f32
    %2 = vector.broadcast %cst : f32 to vector<128x128xf32>
    %3 = arith.subf %2, %1 : vector<128x128xf32>
    %cst_1 = arith.constant -1.000000e+30 : f32
    %4 = vector.broadcast %cst_1 : f32 to vector<128x128xf32>
    %5 = arith.mulf %3, %4 : vector<128x128xf32>
    %c0_2 = arith.constant 0 : index
    %c0_3 = arith.constant 0 : index
    %6 = vector.load %arg1[%c0_2, %c0_3] : memref<128x128xf32, #tpu.memory_space<vmem>>, vector<128x128xf32>
    %c0_4 = arith.constant 0 : index
    %c0_5 = arith.constant 0 : index
    %7 = vector.load %arg2[%c0_4, %c0_5] : memref<256x256xbf16, #tpu.memory_space<vmem>>, vector<256x256xbf16>
    %c0_6 = arith.constant 0 : index
    %c0_7 = arith.constant 0 : index
    %8 = vector.load %arg3[%c0_6, %c0_7] : memref<1x128xf32, #tpu.memory_space<vmem>>, vector<1x128xf32>
    %c0_8 = arith.constant 0 : index
    %c0_9 = arith.constant 0 : index
    %9 = vector.load %arg4[%c0_8, %c0_9] : memref<1x128xf32, #tpu.memory_space<vmem>>, vector<1x128xf32>
    %c0_10 = arith.constant 0 : index
    %c0_11 = arith.constant 0 : index
    %10 = vector.load %arg5[%c0_10, %c0_11] : memref<1x128xf32, #tpu.memory_space<vmem>>, vector<1x128xf32>
    %c0_12 = arith.constant 0 : index
    %c0_13 = arith.constant 0 : index
    %11 = vector.load %arg6[%c0_12, %c0_13] : memref<1x128xf32, #tpu.memory_space<vmem>>, vector<1x128xf32>
    %12 = arith.truncf %6 : vector<128x128xf32> to vector<128x128xbf16>
    %13 = math.tanh %6 : vector<128x128xf32>
    %14 = arith.truncf %13 : vector<128x128xf32> to vector<128x128xbf16>
    %cst_14 = arith.constant dense<0.000000e+00> : vector<128x128xf32>
    %15 = tpu.matmul %14, %12, %cst_14 {dimension_numbers = #tpu.dot_dimension_numbers<[1], [1], [0], [0], [0, 0, 1, 0], [], []>} : vector<128x128xbf16>, vector<128x128xbf16>, vector<128x128xf32> -> vector<128x128xf32>
    %cst_15 = arith.constant 2.000000e-01 : f32
    %16 = vector.broadcast %cst_15 : f32 to vector<128x128xf32>
    %17 = arith.mulf %16, %15 : vector<128x128xf32>
    %18 = arith.maximumf %15, %17 : vector<128x128xf32>
    %19 = arith.addf %18, %5 : vector<128x128xf32>
    %cst_16 = arith.constant dense<0xFF800000> : vector<128xf32>
    %20 = vector.multi_reduction <maximumf>, %19, %cst_16 [1] : vector<128x128xf32> to vector<128xf32>
    %21 = vector.shape_cast %20 : vector<128xf32> to vector<128x1xf32>
    %22 = vector.broadcast %21 : vector<128x1xf32> to vector<128x128xf32>
    %23 = arith.subf %19, %22 : vector<128x128xf32>
    %24 = math.exp %23 : vector<128x128xf32>
    %cst_17 = arith.constant dense<0.000000e+00> : vector<128xf32>
    %25 = vector.multi_reduction <add>, %24, %cst_17 [1] : vector<128x128xf32> to vector<128xf32>
    %26 = vector.shape_cast %25 : vector<128xf32> to vector<128x1xf32>
    %27 = tpu.reciprocal %26 {approx = true} : vector<128x1xf32> -> vector<128x1xf32>
    %28 = vector.broadcast %27 : vector<128x1xf32> to vector<128x128xf32>
    %29 = arith.mulf %24, %28 : vector<128x128xf32>
    %c0_18 = arith.constant 0 : index
    %c0_19 = arith.constant 0 : index
    %30 = vector.load %arg13[%c0_18, %c0_19] : memref<128x128xf32, #tpu.memory_space<vmem>>, vector<128x128xf32>
    tpu.vector_store %arg13[%c0_18, %c0_19], %29 {strides = array<i32>} : memref<128x128xf32, #tpu.memory_space<vmem>>, vector<128x128xf32>,
    %cst_20 = arith.constant dense<0.000000e+00> : vector<128x128xf32>
    %31 = tpu.matmul %0, %12, %cst_20 {dimension_numbers = #tpu.dot_dimension_numbers<[1], [0], [0], [1], [0, 0, 1, 1], [], []>} : vector<128x128xbf16>, vector<128x128xbf16>, vector<128x128xf32> -> vector<128x128xf32>
    %32 = arith.truncf %31 : vector<128x128xf32> to vector<128x128xbf16>
    %33 = tpu.concatenate %32, %12 in 1 : vector<128x128xbf16>, vector<128x128xbf16> -> vector<128x256xbf16>
    %cst_21 = arith.constant dense<0.000000e+00> : vector<128x256xf32>
    %34 = tpu.matmul %33, %7, %cst_21 {dimension_numbers = #tpu.dot_dimension_numbers<[1], [0], [0], [1], [0, 0, 1, 1], [], []>} : vector<128x256xbf16>, vector<256x256xbf16>, vector<128x256xf32> -> vector<128x256xf32>
    %35 = vector.extract_strided_slice %34 {offsets = [0, 0], sizes = [128, 128], strides = [1, 1]} : vector<128x256xf32> to vector<128x128xf32>
    %36 = vector.broadcast %8 : vector<1x128xf32> to vector<128x128xf32>
    %37 = arith.addf %35, %36 : vector<128x128xf32>
    %cst_22 = arith.constant 0.000000e+00 : f32
    %38 = vector.broadcast %cst_22 : f32 to vector<128x128xf32>
    %39 = arith.maximumf %37, %38 : vector<128x128xf32>
    %40 = vector.extract_strided_slice %34 {offsets = [0, 128], sizes = [128, 128], strides = [1, 1]} : vector<128x256xf32> to vector<128x128xf32>
    %41 = vector.broadcast %9 : vector<1x128xf32> to vector<128x128xf32>
    %42 = arith.addf %40, %41 : vector<128x128xf32>
    %cst_23 = arith.constant 0.000000e+00 : f32
    %43 = vector.broadcast %cst_23 : f32 to vector<128x128xf32>
    %44 = arith.maximumf %42, %43 : vector<128x128xf32>
    %45 = arith.addf %39, %44 : vector<128x128xf32>
    %cst_24 = arith.constant dense<0.000000e+00> : vector<128xf32>
    %46 = vector.multi_reduction <add>, %45, %cst_24 [0] : vector<128x128xf32> to vector<128xf32>
    %47 = vector.shape_cast %46 : vector<128xf32> to vector<1x128xf32>
    %cst_25 = arith.constant 1.280000e+02 : f32
    %48 = vector.broadcast %cst_25 : f32 to vector<1x128xf32>
    %49 = arith.divf %47, %48 : vector<1x128xf32>
    %50 = arith.mulf %45, %45 : vector<128x128xf32>
    %cst_26 = arith.constant dense<0.000000e+00> : vector<128xf32>
    %51 = vector.multi_reduction <add>, %50, %cst_26 [0] : vector<128x128xf32> to vector<128xf32>
    %52 = vector.shape_cast %51 : vector<128xf32> to vector<1x128xf32>
    %cst_27 = arith.constant 1.280000e+02 : f32
    %53 = vector.broadcast %cst_27 : f32 to vector<1x128xf32>
    %54 = arith.divf %52, %53 : vector<1x128xf32>
    %55 = arith.mulf %49, %49 : vector<1x128xf32>
    %56 = arith.subf %54, %55 : vector<1x128xf32>
    %cst_28 = arith.constant 0.000000e+00 : f32
    %57 = vector.broadcast %cst_28 : f32 to vector<1x128xf32>
    %58 = arith.maximumf %56, %57 : vector<1x128xf32>
    %59 = vector.broadcast %49 : vector<1x128xf32> to vector<128x128xf32>
    %60 = arith.subf %45, %59 : vector<128x128xf32>
    %cst_29 = arith.constant 9.99999974E-6 : f32
    %61 = vector.broadcast %cst_29 : f32 to vector<1x128xf32>
    %62 = arith.addf %58, %61 : vector<1x128xf32>
    %63 = math.rsqrt %62 : vector<1x128xf32>
    %64 = vector.broadcast %63 : vector<1x128xf32> to vector<128x128xf32>
    %65 = arith.mulf %60, %64 : vector<128x128xf32>
    %66 = vector.broadcast %10 : vector<1x128xf32> to vector<128x128xf32>
    %67 = arith.mulf %65, %66 : vector<128x128xf32>
    %68 = vector.broadcast %11 : vector<1x128xf32> to vector<128x128xf32>
    %69 = arith.addf %67, %68 : vector<128x128xf32>
    %c0_30 = arith.constant 0 : index
    %c0_31 = arith.constant 0 : index
    %70 = vector.load %arg7[%c0_30, %c0_31] : memref<256x256xbf16, #tpu.memory_space<vmem>>, vector<256x256xbf16>
    %c0_32 = arith.constant 0 : index
    %c0_33 = arith.constant 0 : index
    %71 = vector.load %arg8[%c0_32, %c0_33] : memref<1x128xf32, #tpu.memory_space<vmem>>, vector<1x128xf32>
    %c0_34 = arith.constant 0 : index
    %c0_35 = arith.constant 0 : index
    %72 = vector.load %arg9[%c0_34, %c0_35] : memref<1x128xf32, #tpu.memory_space<vmem>>, vector<1x128xf32>
    %c0_36 = arith.constant 0 : index
    %c0_37 = arith.constant 0 : index
    %73 = vector.load %arg10[%c0_36, %c0_37] : memref<1x128xf32, #tpu.memory_space<vmem>>, vector<1x128xf32>
    %c0_38 = arith.constant 0 : index
    %c0_39 = arith.constant 0 : index
    %74 = vector.load %arg11[%c0_38, %c0_39] : memref<1x128xf32, #tpu.memory_space<vmem>>, vector<1x128xf32>
    %75 = arith.truncf %69 : vector<128x128xf32> to vector<128x128xbf16>
    %76 = math.tanh %69 : vector<128x128xf32>
    %77 = arith.truncf %76 : vector<128x128xf32> to vector<128x128xbf16>
    %cst_40 = arith.constant dense<0.000000e+00> : vector<128x128xf32>
    %78 = tpu.matmul %77, %75, %cst_40 {dimension_numbers = #tpu.dot_dimension_numbers<[1], [1], [0], [0], [0, 0, 1, 0], [], []>} : vector<128x128xbf16>, vector<128x128xbf16>, vector<128x128xf32> -> vector<128x128xf32>
    %cst_41 = arith.constant 2.000000e-01 : f32
    %79 = vector.broadcast %cst_41 : f32 to vector<128x128xf32>
    %80 = arith.mulf %79, %78 : vector<128x128xf32>
    %81 = arith.maximumf %78, %80 : vector<128x128xf32>
    %82 = arith.addf %81, %5 : vector<128x128xf32>
    %cst_42 = arith.constant dense<0xFF800000> : vector<128xf32>
    %83 = vector.multi_reduction <maximumf>, %82, %cst_42 [1] : vector<128x128xf32> to vector<128xf32>
    %84 = vector.shape_cast %83 : vector<128xf32> to vector<128x1xf32>
    %85 = vector.broadcast %84 : vector<128x1xf32> to vector<128x128xf32>
    %86 = arith.subf %82, %85 : vector<128x128xf32>
    %87 = math.exp %86 : vector<128x128xf32>
    %cst_43 = arith.constant dense<0.000000e+00> : vector<128xf32>
    %88 = vector.multi_reduction <add>, %87, %cst_43 [1] : vector<128x128xf32> to vector<128xf32>
    %89 = vector.shape_cast %88 : vector<128xf32> to vector<128x1xf32>
    %90 = tpu.reciprocal %89 {approx = true} : vector<128x1xf32> -> vector<128x1xf32>
    %91 = vector.broadcast %90 : vector<128x1xf32> to vector<128x128xf32>
    %92 = arith.mulf %87, %91 : vector<128x128xf32>
    %c0_44 = arith.constant 0 : index
    %c0_45 = arith.constant 0 : index
    %93 = vector.load %arg14[%c0_44, %c0_45] : memref<128x128xf32, #tpu.memory_space<vmem>>, vector<128x128xf32>
    tpu.vector_store %arg14[%c0_44, %c0_45], %92 {strides = array<i32>} : memref<128x128xf32, #tpu.memory_space<vmem>>, vector<128x128xf32>,
    %cst_46 = arith.constant dense<0.000000e+00> : vector<128x128xf32>
    %94 = tpu.matmul %0, %75, %cst_46 {dimension_numbers = #tpu.dot_dimension_numbers<[1], [0], [0], [1], [0, 0, 1, 1], [], []>} : vector<128x128xbf16>, vector<128x128xbf16>, vector<128x128xf32> -> vector<128x128xf32>
    %95 = arith.truncf %94 : vector<128x128xf32> to vector<128x128xbf16>
    %96 = tpu.concatenate %95, %75 in 1 : vector<128x128xbf16>, vector<128x128xbf16> -> vector<128x256xbf16>
    %cst_47 = arith.constant dense<0.000000e+00> : vector<128x256xf32>
    %97 = tpu.matmul %96, %70, %cst_47 {dimension_numbers = #tpu.dot_dimension_numbers<[1], [0], [0], [1], [0, 0, 1, 1], [], []>} : vector<128x256xbf16>, vector<256x256xbf16>, vector<128x256xf32> -> vector<128x256xf32>
    %98 = vector.extract_strided_slice %97 {offsets = [0, 0], sizes = [128, 128], strides = [1, 1]} : vector<128x256xf32> to vector<128x128xf32>
    %99 = vector.broadcast %71 : vector<1x128xf32> to vector<128x128xf32>
    %100 = arith.addf %98, %99 : vector<128x128xf32>
    %cst_48 = arith.constant 0.000000e+00 : f32
    %101 = vector.broadcast %cst_48 : f32 to vector<128x128xf32>
    %102 = arith.maximumf %100, %101 : vector<128x128xf32>
    %103 = vector.extract_strided_slice %97 {offsets = [0, 128], sizes = [128, 128], strides = [1, 1]} : vector<128x256xf32> to vector<128x128xf32>
    %104 = vector.broadcast %72 : vector<1x128xf32> to vector<128x128xf32>
    %105 = arith.addf %103, %104 : vector<128x128xf32>
    %cst_49 = arith.constant 0.000000e+00 : f32
    %106 = vector.broadcast %cst_49 : f32 to vector<128x128xf32>
    %107 = arith.maximumf %105, %106 : vector<128x128xf32>
    %108 = arith.addf %102, %107 : vector<128x128xf32>
    %cst_50 = arith.constant dense<0.000000e+00> : vector<128xf32>
    %109 = vector.multi_reduction <add>, %108, %cst_50 [0] : vector<128x128xf32> to vector<128xf32>
    %110 = vector.shape_cast %109 : vector<128xf32> to vector<1x128xf32>
    %cst_51 = arith.constant 1.280000e+02 : f32
    %111 = vector.broadcast %cst_51 : f32 to vector<1x128xf32>
    %112 = arith.divf %110, %111 : vector<1x128xf32>
    %113 = arith.mulf %108, %108 : vector<128x128xf32>
    %cst_52 = arith.constant dense<0.000000e+00> : vector<128xf32>
    %114 = vector.multi_reduction <add>, %113, %cst_52 [0] : vector<128x128xf32> to vector<128xf32>
    %115 = vector.shape_cast %114 : vector<128xf32> to vector<1x128xf32>
    %cst_53 = arith.constant 1.280000e+02 : f32
    %116 = vector.broadcast %cst_53 : f32 to vector<1x128xf32>
    %117 = arith.divf %115, %116 : vector<1x128xf32>
    %118 = arith.mulf %112, %112 : vector<1x128xf32>
    %119 = arith.subf %117, %118 : vector<1x128xf32>
    %cst_54 = arith.constant 0.000000e+00 : f32
    %120 = vector.broadcast %cst_54 : f32 to vector<1x128xf32>
    %121 = arith.maximumf %119, %120 : vector<1x128xf32>
    %122 = vector.broadcast %112 : vector<1x128xf32> to vector<128x128xf32>
    %123 = arith.subf %108, %122 : vector<128x128xf32>
    %cst_55 = arith.constant 9.99999974E-6 : f32
    %124 = vector.broadcast %cst_55 : f32 to vector<1x128xf32>
    %125 = arith.addf %121, %124 : vector<1x128xf32>
    %126 = math.rsqrt %125 : vector<1x128xf32>
    %127 = vector.broadcast %126 : vector<1x128xf32> to vector<128x128xf32>
    %128 = arith.mulf %123, %127 : vector<128x128xf32>
    %129 = vector.broadcast %73 : vector<1x128xf32> to vector<128x128xf32>
    %130 = arith.mulf %128, %129 : vector<128x128xf32>
    %131 = vector.broadcast %74 : vector<1x128xf32> to vector<128x128xf32>
    %132 = arith.addf %130, %131 : vector<128x128xf32>
    %c0_56 = arith.constant 0 : index
    %c0_57 = arith.constant 0 : index
    %133 = vector.load %arg12[%c0_56, %c0_57] : memref<128x128xf32, #tpu.memory_space<vmem>>, vector<128x128xf32>
    tpu.vector_store %arg12[%c0_56, %c0_57], %132 {strides = array<i32>} : memref<128x128xf32, #tpu.memory_space<vmem>>, vector<128x128xf32>,
    return
  }
}

</mosaic_0001>

<bundles_post_ra>
// kernel: _gcn_forward_impl.1
= control target key start
LH: loop header
LB: loop body
LE: loop exit
PB: predicated region body
PF: predicated region fallthrough
CT: control target
= control target key end

     0   :  { %20 = vsyncpa [#allocation3], 0  ;;  %s4330_s0 = inlined_call_operand.vmem [shape: bf16[128,128], index: 0, kind: input, shape index: {}]   ;;  %s4331_s1 = inlined_call_operand.vmem [shape: f32[128,128], index: 1, kind: input, shape index: {}]   ;;  %s4332_s2 = inlined_call_operand.vmem [shape: bf16[256,256], index: 2, kind: input, shape index: {}]   ;;  %s4333_s3 = inlined_call_operand.vmem [shape: f32[1,128], index: 3, kind: input, shape index: {}]   ;;  %s4334_s4 = inlined_call_operand.vmem [shape: f32[1,128], index: 4, kind: input, shape index: {}]   ;;  %s4335_s5 = inlined_call_operand.vmem [shape: f32[1,128], index: 5, kind: input, shape index: {}]   ;;  %s4336_s6 = inlined_call_operand.vmem [shape: f32[1,128], index: 6, kind: input, shape index: {}]   ;;  %s4337_s7 = inlined_call_operand.vmem [shape: bf16[256,256], index: 7, kind: input, shape index: {}]   ;;  %s4338_s8 = inlined_call_operand.vmem [shape: f32[1,128], index: 8, kind: input, shape index: {}]   ;;  %s4339_s9 = inlined_call_operand.vmem [shape: f32[1,128], index: 9, kind: input, shape index: {}]   ;;  %s4340_s10 = inlined_call_operand.vmem [shape: f32[1,128], index: 10, kind: input, shape index: {}]   ;;  %s4341_s11 = inlined_call_operand.vmem [shape: f32[1,128], index: 11, kind: input, shape index: {}]   ;;  %s4342_s12 = inlined_call_operand.vmem [shape: f32[128,128], index: 12, kind: output, shape index: {0}]   ;;  %s4343_s13 = inlined_call_operand.hbm [shape: f32[128,128], index: 13, kind: output, shape index: {1}]   ;;  %s4344_s14 = inlined_call_operand.hbm [shape: f32[128,128], index: 14, kind: output, shape index: {2}]  }
   0x1   :  { %v2910_v0 = vld [vmem:[%s4331_s1] sm:$0xff]  ;;  %v2915_v1 = vld [vmem:[%s4331_s1 + $0x8] sm:$0xff]  ;;  %v2920_v2 = vld [vmem:[%s4331_s1 + $0x10] sm:$0xff] }
   0x2   :  { %v2924_v3 = vpack.c.bf16 %v2915_v1, %v2910_v0  ;;  %v2929_v4 = vld [vmem:[%s4331_s1 + $0x18] sm:$0xff]  ;;  %v2938_v6 = vld [vmem:[%s4331_s1 + $0x20] sm:$0xff]  ;;  %v2943_v7 = vld [vmem:[%s4331_s1 + $0x28] sm:$0xff] }
   0x3   :  { %v2933_v5 = vpack.c.bf16 %v2929_v4, %v2920_v2  ;;  %v2952_v8 = vpack.c.bf16 %v2943_v7, %v2938_v6  ;;  %v2957_v9 = vld [vmem:[%s4330_s0] sm:$0xff]   ;;  %v2963_v10 = vld [vmem:[%s4331_s1 + $0x30] sm:$0xff]  ;;  %v2968_v11 = vld [vmem:[%s4331_s1 + $0x38] sm:$0xff] }
   0x4   :  { %2372 = vmatprep.subr.bf16.mxu1 %v2924_v3  ;;  %2340 = vmatprep.subr.bf16.mxu0 %v2924_v3  ;;  %v2974_v12 = vpack.c.bf16 %v2968_v11, %v2963_v10  ;;  %v2980_v13 = vld [vmem:[%s4331_s1 + $0x40] sm:$0xff]  ;;  %v2985_v14 = vld [vmem:[%s4331_s1 + $0x48] sm:$0xff]  ;;  %v2998_v16 = vld [vmem:[%s4331_s1 + $0x50] sm:$0xff] }
   0x5   :  { %2373 = vmatpush3.bf16.msra.mxu1 %v2924_v3  ;;  %2341 = vmatpush3.bf16.xpose.msra.mxu0 %v2924_v3  ;;  %v2992_v15 = vpack.c.bf16 %v2985_v14, %v2980_v13  ;;  %v3003_v17 = vld [vmem:[%s4331_s1 + $0x58] sm:$0xff]  ;;  %v3014_v19 = vld [vmem:[%s4331_s1 + $0x60] sm:$0xff]  ;;  %v3019_v20 = vld [vmem:[%s4331_s1 + $0x68] sm:$0xff] }
   0x6   :  { %2374 = vmatprep.subr.bf16.mxu1 %v2933_v5  ;;  %2342 = vmatprep.subr.bf16.mxu0 %v2933_v5  ;;  %v3009_v18 = vpack.c.bf16 %v3003_v17, %v2998_v16  ;;  %v3026_v21 = vpack.c.bf16 %v3019_v20, %v3014_v19  ;;  %v3032_v22 = vld [vmem:[%s4331_s1 + $0x70] sm:$0xff]  ;;  %v3037_v23 = vld [vmem:[%s4331_s1 + $0x78] sm:$0xff]  ;;  %v3048_v25 = vld [vmem:[%s4330_s0 + $0x8] sm:$0xff]  }
   0x7   :  { %2388 = vmatprep.mubr.bf16.mxu1 %v2957_v9  ;;  %v3043_v24 = vpack.c.bf16 %v3037_v23, %v3032_v22  ;;  %v3053_v26 = vld [vmem:[%s4330_s0 + $0x10] sm:$0xff]   ;;  %v2482_v27 = vld [vmem:[%s4332_s2 + $0x4] ss:$8 sps:$4 sm:$0xff]   ;;  %v2480_v28 = vld [vmem:[%s4332_s2] ss:$8 sps:$4 sm:$0xff]  }
   0x8   :  { %v2485_v29 = vld [vmem:[%s4332_s2 + $0x14] ss:$8 sps:$4 sm:$0xff]   ;;  %v2483_v31 = vld [vmem:[%s4332_s2 + $0x10] ss:$8 sps:$4 sm:$0xff]   ;;  %v3081_v32 = vld [vmem:[%s4330_s0 + $0x20] sm:$0xff]  }
   0x9   :  { %2375 = vmatpush3.bf16.msra.mxu1 %v2933_v5  ;;  %v3072_v30 = vld [vmem:[%s4330_s0 + $0x18] sm:$0xff]   ;;  %v2488_v33 = vld [vmem:[%s4332_s2 + $0x24] ss:$8 sps:$4 sm:$0xff]  }
   0xa   :  { %2376 = vmatprep.subr.bf16.mxu1 %v2952_v8 }
   0xd   :  { %2377 = vmatpush3.bf16.msra.mxu1 %v2952_v8  ;;  %2343 = vmatpush3.bf16.xpose.msra.mxu0 %v2933_v5 }
   0xe   :  { %2378 = vmatprep.subr.bf16.mxu1 %v2974_v12  ;;  %2344 = vmatprep.subr.bf16.mxu0 %v2952_v8 }
  0x11   :  { %2379 = vmatpush3.bf16.msra.mxu1 %v2974_v12 }
  0x12   :  { %2380 = vmatprep.subr.bf16.mxu1 %v2992_v15 }
  0x15   :  { %2381 = vmatpush3.bf16.msra.mxu1 %v2992_v15  ;;  %2345 = vmatpush3.bf16.xpose.msra.mxu0 %v2952_v8 }
  0x16   :  { %2382 = vmatprep.subr.bf16.mxu1 %v3009_v18  ;;  %2346 = vmatprep.subr.bf16.mxu0 %v2974_v12 }
  0x19   :  { %2383 = vmatpush3.bf16.msra.mxu1 %v3009_v18 }
  0x1a   :  { %2384 = vmatprep.subr.bf16.mxu1 %v3026_v21 }
  0x1d   :  { %2385 = vmatpush3.bf16.msra.mxu1 %v3026_v21  ;;  %2347 = vmatpush3.bf16.xpose.msra.mxu0 %v2974_v12 }
  0x1e   :  { %2386 = vmatprep.subr.bf16.mxu1 %v3043_v24  ;;  %2348 = vmatprep.subr.bf16.mxu0 %v2992_v15 }
  0x21   :  { %2387 = vmatpush3.bf16.msra.mxu1 %v3043_v24 }
  0x22   :  { %813 = vmatprep.subr.bf16.mxu1 %v2482_v27 }
  0x24   :  { %2389 = vmatmul.mubr.bf16.vlgmr.msra.gmra.mrb[0].mxu1 %v3048_v25 }
  0x25   :  { %2392 = vmatprep.mubr.bf16.mxu1 %v3053_v26  ;;  %814 = vmatpush1.bf16.msra.mxu1 %v2480_v28 }
  0x26   :  { %815 = vmatprep.subr.bf16.mxu1 %v2485_v29  ;;  %2349 = vmatpush3.bf16.xpose.msra.mxu0 %v2992_v15 }
  0x27   :  { %2350 = vmatprep.subr.bf16.mxu0 %v3009_v18 }
  0x28   :  { %21 = vsyncpa [#allocation5], 0  ;;  %v2486_v34 = vld [vmem:[%s4332_s2 + $0x20] ss:$8 sps:$4 sm:$0xff]   ;;  %v2491_v35 = vld [vmem:[%s4332_s2 + $0x34] ss:$8 sps:$4 sm:$0xff]   ;;  %2584 = vtanh.f32 %v2920_v2 }
  0x29   :  { %816 = vmatpush1.bf16.msra.mxu1 %v2483_v31  ;;  %v3100_v36 = vld [vmem:[%s4330_s0 + $0x28] sm:$0xff]   ;;  %v2489_v37 = vld [vmem:[%s4332_s2 + $0x30] ss:$8 sps:$4 sm:$0xff]   ;;  %v2497_v41 = vld [vmem:[%s4332_s2 + $0x54] ss:$8 sps:$4 sm:$0xff]   ;;  %2586 = vtanh.f32 %v2929_v4 }
  0x2a   :  { %817 = vmatprep.subr.bf16.mxu1 %v2488_v33  ;;  %v3108_v38 = vld [vmem:[%s4330_s0 + $0x30] sm:$0xff]   ;;  %v2494_v39 = vld [vmem:[%s4332_s2 + $0x44] ss:$8 sps:$4 sm:$0xff]   ;;  %v2492_v40 = vld [vmem:[%s4332_s2 + $0x40] ss:$8 sps:$4 sm:$0xff]   ;;  %2588 = vtanh.f32 %v2938_v6 }
  0x2b   :  { %v3126_v42 = vld [vmem:[%s4330_s0 + $0x38] sm:$0xff]   ;;  %v2500_v44 = vld [vmem:[%s4332_s2 + $0x64] ss:$8 sps:$4 sm:$0xff]   ;;  %v2498_v45 = vld [vmem:[%s4332_s2 + $0x60] ss:$8 sps:$4 sm:$0xff]   ;;  %2590 = vtanh.f32 %v2943_v7 }
  0x2c   :  { %2393 = vmatmul.mubr.bf16.gmra.mrb[4].mxu1 %v3072_v30  ;;  %v2495_v43 = vld [vmem:[%s4332_s2 + $0x50] ss:$8 sps:$4 sm:$0xff]   ;;  %v2503_v46 = vld [vmem:[%s4332_s2 + $0x74] ss:$8 sps:$4 sm:$0xff]   ;;  %v2506_v48 = vld [vmem:[%s4332_s2 + $0x84] ss:$8 sps:$4 sm:$0xff]   ;;  %2592 = vtanh.f32 %v2963_v10 }
  0x2d   :  { %2396 = vmatprep.mubr.bf16.mxu1 %v3081_v32  ;;  %818 = vmatpush1.bf16.msra.mxu1 %v2486_v34  ;;  %v2501_v47 = vld [vmem:[%s4332_s2 + $0x70] ss:$8 sps:$4 sm:$0xff]   ;;  %v2504_v49 = vld [vmem:[%s4332_s2 + $0x80] ss:$8 sps:$4 sm:$0xff]   ;;  %v2509_v50 = vld [vmem:[%s4332_s2 + $0x94] ss:$8 sps:$4 sm:$0xff]   ;;  %2594 = vtanh.f32 %v2968_v11 }
  0x2e   :  { %819 = vmatprep.subr.bf16.mxu1 %v2491_v35  ;;  %2351 = vmatpush3.bf16.xpose.msra.mxu0 %v3009_v18  ;;  %v2507_v51 = vld [vmem:[%s4332_s2 + $0x90] ss:$8 sps:$4 sm:$0xff]   ;;  %v2512_v52 = vld [vmem:[%s4332_s2 + $0xa4] ss:$8 sps:$4 sm:$0xff]   ;;  %v2510_v53 = vld [vmem:[%s4332_s2 + $0xa0] ss:$8 sps:$4 sm:$0xff]   ;;  %2596 = vtanh.f32 %v2910_v0 }
  0x2f   :  { %2352 = vmatprep.subr.bf16.mxu0 %v3026_v21  ;;  %v2515_v54 = vld [vmem:[%s4332_s2 + $0xb4] ss:$8 sps:$4 sm:$0xff]   ;;  %v2513_v55 = vld [vmem:[%s4332_s2 + $0xb0] ss:$8 sps:$4 sm:$0xff]   ;;  %v2518_v56 = vld [vmem:[%s4332_s2 + $0xc4] ss:$8 sps:$4 sm:$0xff]   ;;  %2598 = vtanh.f32 %v2915_v1 }
  0x30   :  { %v2516_v57 = vld [vmem:[%s4332_s2 + $0xc0] ss:$8 sps:$4 sm:$0xff]   ;;  %v2521_v58 = vld [vmem:[%s4332_s2 + $0xd4] ss:$8 sps:$4 sm:$0xff]   ;;  %v2519_v59 = vld [vmem:[%s4332_s2 + $0xd0] ss:$8 sps:$4 sm:$0xff]   ;;  %2600 = vtanh.f32 %v2980_v13 }
  0x31   :  { %820 = vmatpush1.bf16.msra.mxu1 %v2489_v37  ;;  %v2524_v60 = vld [vmem:[%s4332_s2 + $0xe4] ss:$8 sps:$4 sm:$0xff]   ;;  %v2522_v61 = vld [vmem:[%s4332_s2 + $0xe0] ss:$8 sps:$4 sm:$0xff]   ;;  %v2527_v62 = vld [vmem:[%s4332_s2 + $0xf4] ss:$8 sps:$4 sm:$0xff]   ;;  %2602 = vtanh.f32 %v2985_v14 }
  0x32   :  { %821 = vmatprep.subr.bf16.mxu1 %v2494_v39  ;;  %v2525_v63 = vld [vmem:[%s4332_s2 + $0xf0] ss:$8 sps:$4 sm:$0xff]   ;;  %2604 = vtanh.f32 %v2998_v16 }
  0x33   :  { %2606 = vtanh.f32 %v3003_v17 }
  0x34   :  { %2397 = vmatmul.mubr.bf16.gmra.mrb[8].mxu1 %v3100_v36  ;;  %2608 = vtanh.f32 %v3014_v19 }
  0x35   :  { %2400 = vmatprep.mubr.bf16.mxu1 %v3108_v38  ;;  %822 = vmatpush1.bf16.msra.mxu1 %v2492_v40  ;;  %2610 = vtanh.f32 %v3019_v20  ;;  %v3222_v20 = vld [vmem:[%s4333_s3] ss:$0 sm:$0xff] }
  0x36   :  { %823 = vmatprep.subr.bf16.mxu1 %v2497_v41  ;;  %2353 = vmatpush3.bf16.xpose.msra.mxu0 %v3026_v21  ;;  %2612 = vtanh.f32 %v3032_v22  ;;  %v3227_v22 = vld [vmem:[%s4334_s4] ss:$0 sm:$0xff] }
  0x37   :  { %2354 = vmatprep.subr.bf16.mxu0 %v3043_v24  ;;  %2614 = vtanh.f32 %v3037_v23 }
  0x39   :  { %824 = vmatpush1.bf16.msra.mxu1 %v2495_v43 }
  0x3a   :  { %825 = vmatprep.subr.bf16.mxu1 %v2500_v44 }
  0x3c   :  { %2401 = vmatmul.mubr.bf16.gmra.mrb[12].mxu1 %v3126_v42 }
  0x3d   :  { %826 = vmatpush1.bf16.msra.mxu1 %v2498_v45  ;;  %845 = vmatprep.mubr.bf16.mxu1 %v2924_v3  ;;  %v2585_v3 = vpop.eup %2584 }
  0x3e   :  { %827 = vmatprep.subr.bf16.mxu1 %v2503_v46  ;;  %2355 = vmatpush3.bf16.xpose.msra.mxu0 %v3043_v24  ;;  %v2587_v27 = vpop.eup %2586 }
  0x3f   :  { %v2589_v28 = vpop.eup %2588  ;;  %v188_v34 = vpack.c.bf16 %v2587_v27, %v2585_v3 }
  0x40   :  { %v2591_v29 = vpop.eup %2590 }
  0x41   :  { %828 = vmatpush1.bf16.msra.mxu1 %v2501_v47  ;;  %v2593_v31 = vpop.eup %2592  ;;  %v189_v2 = vpack.c.bf16 %v2591_v29, %v2589_v28 }
  0x42   :  { %829 = vmatprep.subr.bf16.mxu1 %v2506_v48  ;;  %v2595_v33 = vpop.eup %2594 }
  0x43   :  { %v190_v35 = vpack.c.bf16 %v2595_v33, %v2593_v31  ;;  %v2597_v4 = vpop.eup %2596 }
  0x44   :  { %v2599_v6 = vpop.eup %2598 }
  0x45   :  { %830 = vmatpush1.bf16.msra.mxu1 %v2504_v49  ;;  %v187_v7 = vpack.c.bf16 %v2599_v6, %v2597_v4 }
  0x46   :  { %831 = vmatprep.subr.bf16.mxu1 %v2509_v50 }
  0x47   :  { %2356 = vmatprep.mubr.bf16.mxu0 %v187_v7 }
  0x48   :  { %2357 = vmatmul.mubr.bf16.vlgmr.msra.gmra.mrb[0].mxu0 %v188_v34 }
  0x49   :  { %832 = vmatpush1.bf16.msra.mxu1 %v2507_v51  ;;  %2360 = vmatprep.mubr.bf16.mxu0 %v189_v2 }
  0x4a   :  { %833 = vmatprep.subr.bf16.mxu1 %v2512_v52 }
  0x4d   :  { %834 = vmatpush1.bf16.msra.mxu1 %v2510_v53 }
  0x4e   :  { %835 = vmatprep.subr.bf16.mxu1 %v2515_v54 }
  0x50   :  { %2361 = vmatmul.mubr.bf16.gmra.mrb[4].mxu0 %v190_v35 }
  0x51   :  { %836 = vmatpush1.bf16.msra.mxu1 %v2513_v55 }
  0x52   :  { %837 = vmatprep.subr.bf16.mxu1 %v2518_v56 }
  0x55   :  { %838 = vmatpush1.bf16.msra.mxu1 %v2516_v57 }
  0x56   :  { %839 = vmatprep.subr.bf16.mxu1 %v2521_v58 }
  0x59   :  { %840 = vmatpush1.bf16.msra.mxu1 %v2519_v59 }
  0x5a   :  { %841 = vmatprep.subr.bf16.mxu1 %v2524_v60 }
  0x5d   :  { %842 = vmatpush1.bf16.msra.mxu1 %v2522_v61 }
  0x5e   :  { %843 = vmatprep.subr.bf16.mxu1 %v2527_v62 }
  0x61   :  { %844 = vmatpush1.bf16.msra.mxu1 %v2525_v63 }
  0xf7   :  { %v2390_v10 = vpop.f32.mrb[0].mxu1 }
  0xf8   :  { %v582_v11 = vpop.f32.mrb[1].mxu1 }
  0xf9   :  { %v2391_v37 = vpop.f32.mrb[2].mxu1 }
  0xfa   :  { %v646_v39 = vpack.c.bf16 %v2391_v37, %v2390_v10  ;;  %v585_v40 = vpop.f32.mrb[3].mxu1 }
  0xfb   :  { %v645_v41 = vpack.c.bf16 %v585_v40, %v582_v11 }
  0xfd   :  { %846 = vmatmul.mubr.bf16.vlgmr.msra.gmra.mrb[16].mxu1 %v645_v41 }
  0xfe   :  { %855 = vmatprep.mubr.bf16.mxu1 %v2933_v5 }
  0xff   :  { %v2394_v0 = vpop.f32.mrb[4].mxu1 }
 0x100   :  { %v598_v43 = vpop.f32.mrb[5].mxu1 }
 0x101   :  { %v2395_v44 = vpop.f32.mrb[6].mxu1 }
 0x102   :  { %v648_v1 = vpack.c.bf16 %v2395_v44, %v2394_v0  ;;  %v601_v45 = vpop.f32.mrb[7].mxu1 }
 0x103   :  { %v647_v46 = vpack.c.bf16 %v601_v45, %v598_v43 }
 0x105   :  { %856 = vmatmul.mubr.bf16.gmra.mrb[20].mxu1 %v646_v39 }
 0x106   :  { %865 = vmatprep.mubr.bf16.mxu1 %v2952_v8  ;;  %v2601_v8 = vpop.eup %2600 }
 0x107   :  { %v2398_v47 = vpop.f32.mrb[8].mxu1 }
 0x108   :  { %v614_v48 = vpop.f32.mrb[9].mxu1 }
 0x109   :  { %v2399_v49 = vpop.f32.mrb[10].mxu1 }
 0x10a   :  { %v650_v50 = vpack.c.bf16 %v2399_v49, %v2398_v47  ;;  %v617_v51 = vpop.f32.mrb[11].mxu1 }
 0x10b   :  { %v649_v52 = vpack.c.bf16 %v617_v51, %v614_v48 }
 0x10d   :  { %866 = vmatmul.mubr.bf16.gmra.mrb[24].mxu1 %v647_v46 }
 0x10e   :  { %875 = vmatprep.mubr.bf16.mxu1 %v2974_v12  ;;  %v2603_v12 = vpop.eup %2602 }
 0x10f   :  { %v2402_v53 = vpop.f32.mrb[12].mxu1 }
 0x110   :  { %v630_v5 = vpop.f32.mrb[13].mxu1 }
 0x111   :  { %v2403_v54 = vpop.f32.mrb[14].mxu1 }
 0x112   :  { %v652_v55 = vpack.c.bf16 %v2403_v54, %v2402_v53  ;;  %v633_v56 = vpop.f32.mrb[15].mxu1 }
 0x113   :  { %v651_v57 = vpack.c.bf16 %v633_v56, %v630_v5 }
 0x115   :  { %876 = vmatmul.mubr.bf16.gmra.mrb[28].mxu1 %v648_v1 }
 0x116   :  { %885 = vmatprep.mubr.bf16.mxu1 %v2992_v15  ;;  %v2605_v15 = vpop.eup %2604 }
 0x11d   :  { %886 = vmatmul.mubr.bf16.gmra.mrb[32].mxu1 %v649_v52 }
 0x11e   :  { %895 = vmatprep.mubr.bf16.mxu1 %v3009_v18  ;;  %v2607_v18 = vpop.eup %2606 }
 0x11f   :  { %v192_v13 = vpack.c.bf16 %v2607_v18, %v2605_v15  ;;  %v2609_v14 = vpop.eup %2608 }
 0x120   :  { %v2611_v16 = vpop.eup %2610 }
 0x121   :  { %v193_v58 = vpack.c.bf16 %v2611_v16, %v2609_v14 }
 0x125   :  { %896 = vmatmul.mubr.bf16.gmra.mrb[36].mxu1 %v650_v50 }
 0x126   :  { %905 = vmatprep.mubr.bf16.mxu1 %v3026_v21  ;;  %v191_v21 = vpack.c.bf16 %v2603_v12, %v2601_v8 }
 0x128   :  { %2364 = vmatprep.mubr.bf16.mxu0 %v191_v21 }
 0x129   :  { %2365 = vmatmul.mubr.bf16.gmra.mrb[8].mxu0 %v192_v13 }
 0x12a   :  { %2368 = vmatprep.mubr.bf16.mxu0 %v193_v58 }
 0x12d   :  { %906 = vmatmul.mubr.bf16.gmra.mrb[40].mxu1 %v651_v57 }
 0x12e   :  { %915 = vmatprep.mubr.bf16.mxu1 %v3043_v24  ;;  %v2613_v24 = vpop.eup %2612 }
 0x12f   :  { %v2615_v17 = vpop.eup %2614 }
 0x130   :  { %v194_v19 = vpack.c.bf16 %v2615_v17, %v2613_v24 }
 0x132   :  { %2369 = vmatmul.mubr.bf16.gmra.mrb[12].mxu0 %v194_v19 }
 0x135   :  { %916 = vmatmul.mubr.bf16.gmra.mrb[44].mxu1 %v652_v55 }
 0x1d0   :  { %v847_v23 = vpop.f32.mrb[16].mxu1 }
 0x1d1   :  { %v932_v59 = vadd.f32 %v3222_v20, %v847_v23  ;;  %v849_v60 = vpop.f32.mrb[17].mxu1 }
 0x1d2   :  { %v970_v61 = vadd.f32 %v3227_v22, %v849_v60  ;;  %v851_v62 = vpop.f32.mrb[18].mxu1 }
 0x1d3   :  { %v948_v63 = vmax.f32 %v932_v59, 0.0  ;;  %v933_v3 = vadd.f32 %v3222_v20, %v851_v62  ;;  %v853_v27 = vpop.f32.mrb[19].mxu1 }
 0x1d4   :  { %v986_v28 = vmax.f32 %v970_v61, 0.0  ;;  %v971_v29 = vadd.f32 %v3227_v22, %v853_v27 }
 0x1d5   :  { %v949_v31 = vmax.f32 %v933_v3, 0.0 }
 0x1d6   :  { %v3233_v33 = vadd.f32 %v986_v28, %v948_v63  ;;  %v987_v34 = vmax.f32 %v971_v29, 0.0 }
 0x1d8   :  { %v3235_v2 = vadd.f32 %v987_v34, %v949_v31  ;;  %v857_v35 = vpop.f32.mrb[20].mxu1  ;;  %v1041_v7 = vmul.f32 %v3233_v33, %v3233_v33 }
 0x1d9   :  { %v934_v4 = vadd.f32 %v3222_v20, %v857_v35  ;;  %v859_v6 = vpop.f32.mrb[21].mxu1 }
 0x1da   :  { %v1018_v10 = vadd.f32 %v3235_v2, %v3233_v33  ;;  %v1042_v11 = vmul.f32 %v3235_v2, %v3235_v2  ;;  %v972_v37 = vadd.f32 %v3227_v22, %v859_v6  ;;  %v861_v39 = vpop.f32.mrb[22].mxu1 }
 0x1db   :  { %v950_v40 = vmax.f32 %v934_v4, 0.0  ;;  %v935_v41 = vadd.f32 %v3222_v20, %v861_v39  ;;  %v863_v0 = vpop.f32.mrb[23].mxu1 }
 0x1dc   :  { %v1057_v43 = vadd.f32 %v1042_v11, %v1041_v7  ;;  %v988_v44 = vmax.f32 %v972_v37, 0.0  ;;  %v973_v1 = vadd.f32 %v3227_v22, %v863_v0 }
 0x1dd   :  { %v951_v45 = vmax.f32 %v935_v41, 0.0 }
 0x1de   :  { %v3247_v46 = vadd.f32 %v988_v44, %v950_v40  ;;  %v989_v47 = vmax.f32 %v973_v1, 0.0 }
 0x1e0   :  { %v1019_v48 = vadd.f32 %v1018_v10, %v3247_v46  ;;  %v1043_v49 = vmul.f32 %v3247_v46, %v3247_v46  ;;  %v3252_v50 = vadd.f32 %v989_v47, %v951_v45  ;;  %v867_v51 = vpop.f32.mrb[24].mxu1 }
 0x1e1   :  { %v936_v52 = vadd.f32 %v3222_v20, %v867_v51  ;;  %v869_v53 = vpop.f32.mrb[25].mxu1 }
 0x1e2   :  { %v1058_v5 = vadd.f32 %v1057_v43, %v1043_v49  ;;  %v1020_v54 = vadd.f32 %v1019_v48, %v3252_v50  ;;  %v1044_v55 = vmul.f32 %v3252_v50, %v3252_v50  ;;  %v974_v56 = vadd.f32 %v3227_v22, %v869_v53  ;;  %v871_v57 = vpop.f32.mrb[26].mxu1 }
 0x1e3   :  { %v952_v8 = vmax.f32 %v936_v52, 0.0  ;;  %v937_v12 = vadd.f32 %v3222_v20, %v871_v57  ;;  %v873_v15 = vpop.f32.mrb[27].mxu1  ;;  %v3291_v57 = vpop.f32.mrb[0].mxu0 }
 0x1e4   :  { %v1059_v18 = vadd.f32 %v1058_v5, %v1044_v55  ;;  %v990_v21 = vmax.f32 %v974_v56, 0.0  ;;  %v975_v13 = vadd.f32 %v3227_v22, %v873_v15 }
 0x1e5   :  { %v953_v14 = vmax.f32 %v937_v12, 0.0 }
 0x1e6   :  { %v3261_v16 = vadd.f32 %v990_v21, %v952_v8  ;;  %v991_v24 = vmax.f32 %v975_v13, 0.0  ;;  %v3298_v21 = vpop.f32.mrb[1].mxu0 }
 0x1e8   :  { %v1021_v17 = vadd.f32 %v1020_v54, %v3261_v16  ;;  %v1045_v58 = vmul.f32 %v3261_v16, %v3261_v16  ;;  %v3266_v19 = vadd.f32 %v991_v24, %v953_v14  ;;  %v877_v23 = vpop.f32.mrb[28].mxu1 }
 0x1e9   :  { %v938_v59 = vadd.f32 %v3222_v20, %v877_v23  ;;  %v879_v60 = vpop.f32.mrb[29].mxu1 }
 0x1ea   :  { %v1060_v61 = vadd.f32 %v1059_v18, %v1045_v58  ;;  %v1022_v62 = vadd.f32 %v1021_v17, %v3266_v19  ;;  %v1046_v63 = vmul.f32 %v3266_v19, %v3266_v19  ;;  %v976_v3 = vadd.f32 %v3227_v22, %v879_v60  ;;  %v881_v27 = vpop.f32.mrb[30].mxu1 }
 0x1eb   :  { %v954_v28 = vmax.f32 %v938_v59, 0.0  ;;  %v939_v29 = vadd.f32 %v3222_v20, %v881_v27  ;;  %v883_v31 = vpop.f32.mrb[31].mxu1 }
 0x1ec   :  { %v1061_v34 = vadd.f32 %v1060_v61, %v1046_v63  ;;  %v992_v35 = vmax.f32 %v976_v3, 0.0  ;;  %v977_v4 = vadd.f32 %v3227_v22, %v883_v31 }
 0x1ed   :  { %v955_v6 = vmax.f32 %v939_v29, 0.0 }
 0x1ee   :  { %v3275_v7 = vadd.f32 %v992_v35, %v954_v28  ;;  %v993_v10 = vmax.f32 %v977_v4, 0.0 }
 0x1f0   :  { %v1023_v11 = vadd.f32 %v1022_v62, %v3275_v7  ;;  %v1047_v37 = vmul.f32 %v3275_v7, %v3275_v7  ;;  %v3280_v39 = vadd.f32 %v993_v10, %v955_v6  ;;  %v887_v40 = vpop.f32.mrb[32].mxu1 }
 0x1f1   :  { %v940_v41 = vadd.f32 %v3222_v20, %v887_v40  ;;  %v889_v0 = vpop.f32.mrb[33].mxu1  ;;  %v63_v40 = vunpack.c.l.bf16 %v2957_v9 }
 0x1f2   :  { %v1062_v43 = vadd.f32 %v1061_v34, %v1047_v37  ;;  %v1024_v44 = vadd.f32 %v1023_v11, %v3280_v39  ;;  %v1048_v1 = vmul.f32 %v3280_v39, %v3280_v39  ;;  %v978_v45 = vadd.f32 %v3227_v22, %v889_v0  ;;  %v891_v47 = vpop.f32.mrb[34].mxu1  ;;  %v3309_v34 = vpop.f32.mrb[2].mxu0 }
 0x1f3   :  { %v956_v48 = vmax.f32 %v940_v41, 0.0  ;;  %v941_v49 = vadd.f32 %v3222_v20, %v891_v47  ;;  %v893_v51 = vpop.f32.mrb[35].mxu1  ;;  %v294_v11 = vmul.f32 0.2, %v3291_v57  ;;  %v232_v37 = vpop.f32.mrb[3].mxu0 }
 0x1f4   :  { %v1063_v52 = vadd.f32 %v1062_v43, %v1048_v1  ;;  %v994_v53 = vmax.f32 %v978_v45, 0.0  ;;  %v979_v5 = vadd.f32 %v3227_v22, %v893_v51  ;;  %v292_v43 = vmul.f32 0.2, %v3298_v21 }
 0x1f5   :  { %v957_v54 = vmax.f32 %v941_v49, 0.0  ;;  %v64_v51 = vunpack.c.h.bf16 %v2957_v9 }
 0x1f6   :  { %v3289_v55 = vadd.f32 %v994_v53, %v956_v48  ;;  %v995_v56 = vmax.f32 %v979_v5, 0.0 }
 0x1f8   :  { %v1025_v8 = vadd.f32 %v1024_v44, %v3289_v55  ;;  %v1049_v12 = vmul.f32 %v3289_v55, %v3289_v55  ;;  %v3296_v15 = vadd.f32 %v995_v56, %v957_v54  ;;  %v897_v18 = vpop.f32.mrb[36].mxu1  ;;  %v295_v44 = vmul.f32 0.2, %v3309_v34 }
 0x1f9   :  { %v942_v13 = vadd.f32 %v3222_v20, %v897_v18  ;;  %v899_v14 = vpop.f32.mrb[37].mxu1  ;;  %v293_v54 = vmul.f32 0.2, %v232_v37  ;;  %v65_v18 = vunpack.c.l.bf16 %v3048_v25 }
 0x1fa   :  { %v1064_v24 = vadd.f32 %v1063_v52, %v1049_v12  ;;  %v1026_v17 = vadd.f32 %v1025_v8, %v3296_v15  ;;  %v1050_v58 = vmul.f32 %v3296_v15, %v3296_v15  ;;  %v980_v23 = vadd.f32 %v3227_v22, %v899_v14  ;;  %v901_v59 = vpop.f32.mrb[38].mxu1 }
 0x1fb   :  { %v958_v60 = vmax.f32 %v942_v13, 0.0  ;;  %v943_v61 = vadd.f32 %v3222_v20, %v901_v59  ;;  %v903_v62 = vpop.f32.mrb[39].mxu1  ;;  %v310_v14 = vmax.f32 %v3291_v57, %v294_v11  ;;  %v311_v59 = vmax.f32 %v3309_v34, %v295_v44 }
 0x1fc   :  { %v1065_v63 = vadd.f32 %v1064_v24, %v1050_v58  ;;  %v996_v3 = vmax.f32 %v980_v23, 0.0  ;;  %v981_v27 = vadd.f32 %v3227_v22, %v903_v62  ;;  %v308_v24 = vmax.f32 %v3298_v21, %v292_v43 }
 0x1fd   :  { %v959_v28 = vmax.f32 %v943_v61, 0.0  ;;  %v309_v61 = vmax.f32 %v232_v37, %v293_v54 }
 0x1fe   :  { %v3307_v29 = vadd.f32 %v996_v3, %v958_v60  ;;  %v997_v31 = vmax.f32 %v981_v27, 0.0  ;;  %v81_v60 = vsub.f32 1.0, %v65_v18  ;;  %v80_v3 = vsub.f32 1.0, %v64_v51 }
 0x200   :  { %v1027_v35 = vadd.f32 %v1026_v17, %v3307_v29  ;;  %v1051_v4 = vmul.f32 %v3307_v29, %v3307_v29  ;;  %v3314_v6 = vadd.f32 %v997_v31, %v959_v28  ;;  %v907_v10 = vpop.f32.mrb[40].mxu1  ;;  %v79_v17 = vsub.f32 1.0, %v63_v40 }
 0x201   :  { %v944_v41 = vadd.f32 %v3222_v20, %v907_v10  ;;  %v909_v0 = vpop.f32.mrb[41].mxu1  ;;  %v3342_v31 = vmul.f32 -1e+30, %v81_v60  ;;  %v3348_v11 = vmul.f32 -1e+30, %v80_v3 }
 0x202   :  { %v1066_v1 = vadd.f32 %v1065_v63, %v1051_v4  ;;  %v1028_v45 = vadd.f32 %v1027_v35, %v3314_v6  ;;  %v1052_v47 = vmul.f32 %v3314_v6, %v3314_v6  ;;  %v982_v48 = vadd.f32 %v3227_v22, %v909_v0  ;;  %v911_v49 = vpop.f32.mrb[42].mxu1 }
 0x203   :  { %v960_v52 = vmax.f32 %v944_v41, 0.0  ;;  %v945_v53 = vadd.f32 %v3222_v20, %v911_v49  ;;  %v913_v5 = vpop.f32.mrb[43].mxu1  ;;  %v3334_v62 = vmul.f32 -1e+30, %v79_v17  ;;  %v66_v63 = vunpack.c.h.bf16 %v3048_v25 }
 0x204   :  { %v1067_v56 = vadd.f32 %v1066_v1, %v1052_v47  ;;  %v998_v8 = vmax.f32 %v982_v48, 0.0  ;;  %v983_v12 = vadd.f32 %v3227_v22, %v913_v5  ;;  %v3356_v47 = vadd.f32 %v310_v14, %v3342_v31 }
 0x205   :  { %v961_v13 = vmax.f32 %v945_v53, 0.0  ;;  %v3346_v4 = vadd.f32 %v308_v24, %v3334_v62  ;;  %v82_v10 = vsub.f32 1.0, %v66_v63  ;;  %v3363_v53 = vadd.f32 %v309_v61, %v3348_v11 }
 0x206   :  { %v3331_v58 = vadd.f32 %v998_v8, %v960_v52  ;;  %v999_v23 = vmax.f32 %v983_v12, 0.0  ;;  %4354 = vst [vmem:[#allocation8_spill] sm:$0xff] %v3356_v47  ;;  %344 = vmax.xlane.f32.xlu1 %v3356_v47 }
 0x207   :  { %340 = vmax.xlane.f32.xlu0 %v3346_v4  ;;  %v3359_v48 = vmul.f32 -1e+30, %v82_v10 }
 0x208   :  { %v1029_v27 = vadd.f32 %v1028_v45, %v3331_v58  ;;  %v1053_v57 = vmul.f32 %v3331_v58, %v3331_v58  ;;  %v3340_v28 = vadd.f32 %v999_v23, %v961_v13  ;;  %v917_v21 = vpop.f32.mrb[44].mxu1 }
 0x209   :  { %v946_v35 = vadd.f32 %v3222_v20, %v917_v21  ;;  %v919_v34 = vpop.f32.mrb[45].mxu1  ;;  %v3381_v21 = vpop.f32.mrb[4].mxu0 }
 0x20a   :  { %v1068_v37 = vadd.f32 %v1067_v56, %v1053_v57  ;;  %v1030_v40 = vadd.f32 %v1029_v27, %v3340_v28  ;;  %v1054_v41 = vmul.f32 %v3340_v28, %v3340_v28  ;;  %v984_v0 = vadd.f32 %v3227_v22, %v919_v34  ;;  %v921_v43 = vpop.f32.mrb[46].mxu1 }
 0x20b   :  { %v962_v44 = vmax.f32 %v946_v35, 0.0  ;;  %v947_v1 = vadd.f32 %v3222_v20, %v921_v43  ;;  %v923_v45 = vpop.f32.mrb[47].mxu1  ;;  %v3367_v20 = vadd.f32 %v311_v59, %v3359_v48  ;;  %342 = vmax.xlane.f32.xlu0 %v3363_v53  ;;  %v3384_v10 = vmul.f32 0.2, %v3381_v21 }
 0x20c   :  { %v1069_v49 = vadd.f32 %v1068_v37, %v1054_v41  ;;  %v1000_v51 = vmax.f32 %v984_v0, 0.0  ;;  %v985_v52 = vadd.f32 %v3227_v22, %v923_v45  ;;  %v3386_v37 = vpop.f32.mrb[5].mxu0 }
 0x20d   :  { %v963_v5 = vmax.f32 %v947_v1, 0.0  ;;  %4355 = vst [vmem:[#allocation9_spill] sm:$0xff] %v3367_v20  ;;  %346 = vmax.xlane.f32.xlu1 %v3367_v20  ;;  %v2363_v41 = vpop.f32.mrb[6].mxu0  ;;  %v314_v1 = vmax.f32 %v3381_v21, %v3384_v10  ;;  %v70_v10 = vunpack.c.h.bf16 %v3072_v30  ;;  %v72_v21 = vunpack.c.h.bf16 %v3081_v32 }
 0x20e   :  { %v3369_v54 = vadd.f32 %v1000_v51, %v962_v44  ;;  %v1001_v56 = vmax.f32 %v985_v52, 0.0  ;;  %v3393_v44 = vpop.f32.mrb[7].mxu0 }
 0x210   :  { %v1031_v8 = vadd.f32 %v1030_v40, %v3369_v54  ;;  %v1055_v12 = vmul.f32 %v3369_v54, %v3369_v54  ;;  %v3375_v22 = vadd.f32 %v1001_v56, %v963_v5  ;;  %v3389_v40 = vmul.f32 0.2, %v3386_v37 }
 0x212   :  { %v1070_v18 = vadd.f32 %v1069_v49, %v1055_v12  ;;  %v1032_v13 = vadd.f32 %v1031_v8, %v3375_v22  ;;  %v1056_v14 = vmul.f32 %v3375_v22, %v3375_v22  ;;  %v312_v45 = vmax.f32 %v3386_v37, %v3389_v40 }
 0x213   :  { %v299_v49 = vmul.f32 0.2, %v2363_v41  ;;  %v71_v8 = vunpack.c.l.bf16 %v3081_v32 }
 0x214   :  { %v1033_v24 = vrot.slane %v1032_v13, 4  ;;  %v1071_v17 = vadd.f32 %v1070_v18, %v1056_v14 }
 0x216   :  { %v1034_v23 = vadd.f32 %v1033_v24, %v1032_v13  ;;  %v1072_v59 = vrot.slane %v1071_v17, 4 }
 0x218   :  { %v1035_v60 = vrot.slane %v1034_v23, 2  ;;  %v1073_v61 = vadd.f32 %v1072_v59, %v1071_v17 }
 0x21a   :  { %v1036_v63 = vadd.f32 %v1035_v60, %v1034_v23  ;;  %v1074_v3 = vrot.slane %v1073_v61, 2 }
 0x21c   :  { %v1037_v27 = vrot.slane %v1036_v63, 1  ;;  %v1075_v57 = vadd.f32 %v1074_v3, %v1073_v61 }
 0x21e   :  { %v1038_v35 = vadd.f32 %v1037_v27, %v1036_v63  ;;  %v1076_v34 = vrot.slane %v1075_v57, 1  ;;  %v74_v27 = vunpack.c.h.bf16 %v3100_v36  ;;  %v86_v63 = vsub.f32 1.0, %v70_v10 }
 0x220   :  { %v3391_v0 = vmul.f32 0.0078125, %v1038_v35  ;;  %v1077_v43 = vadd.f32 %v1076_v34, %v1075_v57  ;;  %v315_v35 = vmax.f32 %v2363_v41, %v299_v49  ;;  %v297_v34 = vmul.f32 0.2, %v3393_v44  ;;  %v2366_v41 = vpop.f32.mrb[8].mxu0 }
 0x221   :  { %v73_v57 = vunpack.c.l.bf16 %v3100_v36  ;;  %v90_v59 = vsub.f32 1.0, %v74_v27  ;;  %v261_v17 = vpop.f32.mrb[9].mxu0  ;;  %v3442_v24 = vmul.f32 -1e+30, %v86_v63 }
 0x222   :  { %v1078_v51 = vmul.f32 0.0078125, %v1077_v43  ;;  %v1079_v52 = vmul.f32 %v3391_v0, %v3391_v0  ;;  %v69_v43 = vunpack.c.l.bf16 %v3072_v30  ;;  %v313_v23 = vmax.f32 %v3393_v44, %v297_v34  ;;  %v2367_v10 = vpop.f32.mrb[10].mxu0 }
 0x223   :  { %v89_v13 = vsub.f32 1.0, %v73_v57  ;;  %v300_v18 = vmul.f32 0.2, %v261_v17  ;;  %v264_v44 = vpop.f32.mrb[11].mxu0  ;;  %v4370_v20 = vsub.f32 %v3275_v7, %v3391_v0 }
 0x224   :  { %v1080_v14 = vsub.f32 %v1078_v51, %v1079_v52  ;;  %v68_v52 = vunpack.c.h.bf16 %v3053_v26  ;;  %v85_v61 = vsub.f32 1.0, %v69_v43  ;;  %v88_v43 = vsub.f32 1.0, %v72_v21 }
 0x225   :  { %v316_v34 = vmax.f32 %v261_v17, %v300_v18 }
 0x226   :  { %v1081_v3 = vmax.f32 %v1080_v14, 0.0  ;;  %v67_v14 = vunpack.c.l.bf16 %v3053_v26  ;;  %v84_v49 = vsub.f32 1.0, %v68_v52  ;;  %v3444_v12 = vmul.f32 -1e+30, %v85_v61 }
 0x227   :  { %v303_v52 = vmul.f32 0.2, %v2367_v10  ;;  %v301_v61 = vmul.f32 0.2, %v264_v44  ;;  %v3472_v17 = vmul.f32 -1e+30, %v88_v43 }
 0x228   :  { %v1098_v51 = vadd.f32 1e-05, %v1081_v3  ;;  %v83_v60 = vsub.f32 1.0, %v67_v14  ;;  %v302_v3 = vmul.f32 0.2, %v2366_v41  ;;  %v3453_v63 = vadd.f32 %v314_v1, %v3444_v12 }
 0x229   :  { %v3450_v27 = vmul.f32 -1e+30, %v84_v49  ;;  %v319_v21 = vmax.f32 %v2367_v10, %v303_v52  ;;  %v317_v18 = vmax.f32 %v264_v44, %v301_v61  ;;  %4361 = vst [vmem:[#allocation15_spill] sm:$0xff] %v3472_v17 }
 0x22a   :  { %2616 = vrsqrt.f32 %v1098_v51  ;;  %v318_v56 = vmax.f32 %v2366_v41, %v302_v3  ;;  %v3448_v51 = vadd.f32 %v315_v35, %v3442_v24  ;;  %4357 = vst [vmem:[#allocation11_spill] sm:$0xff] %v3453_v63  ;;  %v3455_v57 = vmul.f32 -1e+30, %v83_v60  ;;  %352 = vmax.xlane.f32.xlu0 %v3453_v63  ;;  %v3484_v3 = vpop.f32.mrb[12].mxu0 }
 0x22b   :  { %v3459_v14 = vadd.f32 %v313_v23, %v3450_v27  ;;  %v3461_v41 = vmul.f32 -1e+30, %v90_v59  ;;  %v3463_v35 = vmul.f32 -1e+30, %v89_v13  ;;  %v87_v60 = vsub.f32 1.0, %v71_v8  ;;  %v3497_v43 = vpop.f32.mrb[13].mxu0 }
 0x22c   :  { %4356 = vst [vmem:[#allocation10_spill] sm:$0xff] %v3448_v51  ;;  %354 = vmax.xlane.f32.xlu1 %v3448_v51  ;;  %v3470_v1 = vadd.f32 %v312_v45, %v3455_v57  ;;  %v78_v23 = vunpack.c.h.bf16 %v3126_v42  ;;  %v77_v13 = vunpack.c.l.bf16 %v3126_v42  ;;  %v3482_v59 = vld [vmem:[%s4335_s5] ss:$0 sm:$0xff]  ;;  %v76_v45 = vunpack.c.h.bf16 %v3108_v38 }
 0x22d   :  { %4358 = vst [vmem:[#allocation12_spill] sm:$0xff] %v3459_v14  ;;  %4359 = vst [vmem:[#allocation13_spill] sm:$0xff] %v3461_v41  ;;  %v3475_v49 = vadd.f32 %v319_v21, %v3461_v41  ;;  %v3487_v37 = vadd.f32 %v318_v56, %v3463_v35  ;;  %v3489_v40 = vmul.f32 -1e+30, %v87_v60  ;;  %v75_v8 = vunpack.c.l.bf16 %v3108_v38  ;;  %v3512_v60 = vpop.f32.mrb[14].mxu0 }
 0x22e   :  { %4360 = vst [vmem:[#allocation14_spill] sm:$0xff] %v3470_v1  ;;  %v3495_v10 = vmul.f32 0.2, %v3484_v3  ;;  %v3500_v52 = vadd.f32 %v317_v18, %v3472_v17  ;;  %v3502_v44 = vsub.f32 1.0, %v78_v23  ;;  %v3504_v56 = vsub.f32 1.0, %v77_v13  ;;  %348 = vmax.xlane.f32.xlu0 %v3470_v1  ;;  %v3537_v17 = vpop.f32.mrb[15].mxu0 }
 0x22f   :  { %4362 = vst [vmem:[#allocation16_spill] sm:$0xff] %v3489_v40  ;;  %v3510_v21 = vmul.f32 0.2, %v3497_v43  ;;  %v3515_v5 = vadd.f32 %v316_v34, %v3489_v40  ;;  %v3517_v51 = vsub.f32 1.0, %v76_v45  ;;  %v3519_v18 = vsub.f32 1.0, %v75_v8 }
 0x230   :  { %350 = vmax.xlane.f32.xlu1 %v3459_v14  ;;  %v4363_v23 = vsub.f32 %v3375_v22, %v3391_v0  ;;  %v4364_v63 = vsub.f32 %v3233_v33, %v3391_v0  ;;  %v4365_v1 = vsub.f32 %v3235_v2, %v3391_v0  ;;  %v4366_v45 = vsub.f32 %v3247_v46, %v3391_v0  ;;  %v2530_v22 = vld [vmem:[%s4337_s7 + $0x4] ss:$8 sps:$4 sm:$0xff]   ;;  %v3545_v33 = vld [vmem:[%s4336_s6] ss:$0 sm:$0xff] }
 0x231   :  { %v4367_v2 = vsub.f32 %v3252_v50, %v3391_v0  ;;  %v4368_v46 = vsub.f32 %v3261_v16, %v3391_v0  ;;  %v2528_v50 = vld [vmem:[%s4337_s7] ss:$8 sps:$4 sm:$0xff]   ;;  %1798 = vmatprep.subr.bf16.mxu1 %v2530_v22 }
 0x232   :  { %360 = vmax.xlane.f32.xlu0 %v3487_v37  ;;  %1799 = vmatpush1.bf16.msra.mxu1 %v2528_v50 }
 0x234   :  { %v3506_v61 = vpop.eup %2616  ;;  %362 = vmax.xlane.f32.xlu1 %v3475_v49 }
 0x235   :  { %v1115_v13 = vmul.f32 %v3506_v61, %v4363_v23  ;;  %v1100_v14 = vmul.f32 %v3506_v61, %v4364_v63  ;;  %v1101_v34 = vmul.f32 %v3506_v61, %v4365_v1  ;;  %v1102_v8 = vmul.f32 %v3506_v61, %v4366_v45 }
 0x236   :  { %v1103_v63 = vmul.f32 %v3506_v61, %v4367_v2  ;;  %v1104_v1 = vmul.f32 %v3506_v61, %v4368_v46  ;;  %v4369_v23 = vsub.f32 %v3266_v19, %v3391_v0  ;;  %v1106_v40 = vmul.f32 %v3506_v61, %v4370_v20  ;;  %356 = vmax.xlane.f32.xlu0 %v3515_v5 }
 0x237   :  { %v1137_v2 = vmul.f32 %v3482_v59, %v1115_v13  ;;  %v1122_v16 = vmul.f32 %v3482_v59, %v1100_v14  ;;  %v1123_v46 = vmul.f32 %v3482_v59, %v1101_v34  ;;  %v1124_v47 = vmul.f32 %v3482_v59, %v1102_v8 }
 0x238   :  { %v1105_v45 = vmul.f32 %v3506_v61, %v4369_v23  ;;  %v1125_v19 = vmul.f32 %v3482_v59, %v1103_v63  ;;  %v1126_v7 = vmul.f32 %v3482_v59, %v1104_v1  ;;  %v4371_v23 = vsub.f32 %v3280_v39, %v3391_v0  ;;  %358 = vmax.xlane.f32.xlu1 %v3500_v52 }
 0x239   :  { %v3580_v14 = vadd.f32 %v3545_v33, %v1137_v2  ;;  %v1144_v13 = vadd.f32 %v3545_v33, %v1122_v16  ;;  %v1145_v34 = vadd.f32 %v3545_v33, %v1123_v46  ;;  %v1146_v8 = vadd.f32 %v3545_v33, %v1124_v47 }
 0x23a   :  { %v1127_v20 = vmul.f32 %v3482_v59, %v1105_v45  ;;  %v1107_v41 = vmul.f32 %v3506_v61, %v4371_v23  ;;  %v1147_v63 = vadd.f32 %v3545_v33, %v1125_v19  ;;  %v1148_v1 = vadd.f32 %v3545_v33, %v1126_v7 }
 0x23b   :  { %v1128_v45 = vmul.f32 %v3482_v59, %v1106_v40  ;;  %v3589_v23 = vpack.c.bf16 %v1145_v34, %v1144_v13  ;;  %2618 = vtanh.f32 %v1146_v8  ;;  %v4372_v16 = vsub.f32 %v3289_v55, %v3391_v0 }
 0x23c   :  { %v1149_v39 = vadd.f32 %v3545_v33, %v1127_v20  ;;  %v1129_v2 = vmul.f32 %v3482_v59, %v1107_v41  ;;  %v3597_v22 = vpack.c.bf16 %v1147_v63, %v1146_v8  ;;  %2620 = vtanh.f32 %v1147_v63 }
 0x23d   :  { %v1108_v47 = vmul.f32 %v3506_v61, %v4372_v16  ;;  %v1150_v40 = vadd.f32 %v3545_v33, %v1128_v45  ;;  %2404 = vmatprep.subr.bf16.mxu0 %v3589_v23  ;;  %1830 = vmatprep.mubr.bf16.mxu1 %v3589_v23  ;;  %2622 = vtanh.f32 %v1144_v13  ;;  %v4373_v41 = vsub.f32 %v3296_v15, %v3391_v0 }
 0x23e   :  { %v3599_v46 = vpack.c.bf16 %v1149_v39, %v1148_v1  ;;  %v1151_v55 = vadd.f32 %v3545_v33, %v1129_v2  ;;  %2405 = vmatpush3.bf16.xpose.msra.mxu0 %v3589_v23  ;;  %2624 = vtanh.f32 %v1145_v34  ;;  %v4374_v7 = vsub.f32 %v3307_v29, %v3391_v0 }
 0x23f   :  { %v1109_v50 = vmul.f32 %v3506_v61, %v4373_v41  ;;  %v1130_v19 = vmul.f32 %v3482_v59, %v1108_v47  ;;  %v4375_v13 = vsub.f32 %v3314_v6, %v3391_v0  ;;  %v4376_v15 = vsub.f32 %v3331_v58, %v3391_v0  ;;  %2406 = vmatprep.subr.bf16.mxu0 %v3597_v22 }
 0x240   :  { %v1110_v20 = vmul.f32 %v3506_v61, %v4374_v7  ;;  %v3625_v45 = vpack.c.bf16 %v1151_v55, %v1150_v40  ;;  %v4377_v2 = vsub.f32 %v3340_v28, %v3391_v0  ;;  %v4378_v41 = vsub.f32 %v3369_v54, %v3391_v0  ;;  %v2531_v54 = vld [vmem:[%s4337_s7 + $0x10] ss:$8 sps:$4 sm:$0xff]   ;;  %v2533_v0 = vld [vmem:[%s4337_s7 + $0x14] ss:$8 sps:$4 sm:$0xff]  }
 0x241   :  { %v1111_v8 = vmul.f32 %v3506_v61, %v4375_v13  ;;  %v1112_v63 = vmul.f32 %v3506_v61, %v4376_v15  ;;  %v1131_v34 = vmul.f32 %v3482_v59, %v1109_v50  ;;  %v1152_v29 = vadd.f32 %v3545_v33, %v1130_v19  ;;  %1800 = vmatprep.subr.bf16.mxu1 %v2533_v0 }
 0x242   :  { %v1113_v6 = vmul.f32 %v3506_v61, %v4377_v2  ;;  %v1132_v16 = vmul.f32 %v3482_v59, %v1110_v20  ;;  %v1114_v7 = vmul.f32 %v3506_v61, %v4378_v41  ;;  %2626 = vtanh.f32 %v1148_v1  ;;  %1801 = vmatpush1.bf16.msra.mxu1 %v2531_v54  ;;  %v2542_v54 = vld [vmem:[%s4337_s7 + $0x44] ss:$8 sps:$4 sm:$0xff]  }
 0x243   :  { %v1133_v47 = vmul.f32 %v3482_v59, %v1111_v8  ;;  %v1134_v58 = vmul.f32 %v3482_v59, %v1112_v63  ;;  %v1153_v50 = vadd.f32 %v3545_v33, %v1131_v34  ;;  %v322_v28 = vmax.f32 %v3484_v3, %v3495_v10 }
 0x244   :  { %v1135_v19 = vmul.f32 %v3482_v59, %v1113_v6  ;;  %v1154_v13 = vadd.f32 %v3545_v33, %v1132_v16  ;;  %v1136_v15 = vmul.f32 %v3482_v59, %v1114_v7  ;;  %2628 = vtanh.f32 %v1149_v39 }
 0x245   :  { %v1155_v20 = vadd.f32 %v3545_v33, %v1133_v47  ;;  %v1156_v8 = vadd.f32 %v3545_v33, %v1134_v58  ;;  %v3654_v61 = vpack.c.bf16 %v1153_v50, %v1152_v29  ;;  %v320_v10 = vmax.f32 %v3497_v43, %v3510_v21  ;;  %v3663_v34 = vpop.eup %2618 }
 0x246   :  { %v1157_v3 = vadd.f32 %v3545_v33, %v1135_v19  ;;  %v1158_v59 = vadd.f32 %v3545_v33, %v1136_v15  ;;  %2630 = vtanh.f32 %v1150_v40  ;;  %v307_v63 = vmul.f32 0.2, %v3512_v60  ;;  %v3671_v43 = vpop.eup %2620  ;;  %2407 = vmatpush3.bf16.xpose.msra.mxu0 %v3597_v22  ;;  %v2540_v15 = vld [vmem:[%s4337_s7 + $0x40] ss:$8 sps:$4 sm:$0xff]  }
 0x247   :  { %v3659_v1 = vpack.c.bf16 %v1155_v20, %v1154_v13  ;;  %2632 = vtanh.f32 %v1151_v55  ;;  %v305_v6 = vmul.f32 0.2, %v3537_v17  ;;  %v3669_v39 = vmul.f32 -1e+30, %v3502_v44  ;;  %v2534_v55 = vld [vmem:[%s4337_s7 + $0x20] ss:$8 sps:$4 sm:$0xff]   ;;  %v2623_v16 = vpop.eup %2622  ;;  %2408 = vmatprep.subr.bf16.mxu0 %v3599_v46 }
 0x248   :  { %v3665_v2 = vpack.c.bf16 %v1157_v3, %v1156_v8  ;;  %v3675_v21 = vpack.c.bf16 %v3580_v14, %v1158_v59  ;;  %2634 = vtanh.f32 %v1152_v29  ;;  %v323_v33 = vmax.f32 %v3512_v60, %v307_v63  ;;  %v2536_v44 = vld [vmem:[%s4337_s7 + $0x24] ss:$8 sps:$4 sm:$0xff]   ;;  %v2625_v29 = vpop.eup %2624 }
 0x249   :  { %v3679_v40 = vmul.f32 -1e+30, %v3504_v56  ;;  %v1221_v47 = vpack.c.bf16 %v3671_v43, %v3663_v34  ;;  %2636 = vtanh.f32 %v1153_v50  ;;  %v321_v60 = vmax.f32 %v3537_v17, %v305_v6  ;;  %1802 = vmatprep.subr.bf16.mxu1 %v2536_v44  ;;  %v2537_v17 = vld [vmem:[%s4337_s7 + $0x30] ss:$8 sps:$4 sm:$0xff]   ;;  %v2563_v34 = vld [vmem:[%s4337_s7 + $0xb4] ss:$8 sps:$4 sm:$0xff]  }
 0x24a   :  { %v3692_v56 = vmul.f32 -1e+30, %v3517_v51  ;;  %2638 = vtanh.f32 %v1154_v13  ;;  %v3695_v58 = vadd.f32 %v323_v33, %v3669_v39  ;;  %v3701_v7 = vmul.f32 -1e+30, %v3519_v18  ;;  %1803 = vmatpush1.bf16.msra.mxu1 %v2534_v55  ;;  %v2539_v18 = vld [vmem:[%s4337_s7 + $0x34] ss:$8 sps:$4 sm:$0xff]  }
 0x24b   :  { %v3698_v41 = vadd.f32 %v322_v28, %v3679_v40  ;;  %v1220_v19 = vpack.c.bf16 %v2625_v29, %v2623_v16  ;;  %2640 = vtanh.f32 %v1155_v20  ;;  %1804 = vmatprep.subr.bf16.mxu1 %v2539_v18  ;;  %v2545_v18 = vld [vmem:[%s4337_s7 + $0x54] ss:$8 sps:$4 sm:$0xff]   ;;  %v2566_v43 = vld [vmem:[%s4337_s7 + $0xc4] ss:$8 sps:$4 sm:$0xff]  }
 0x24c   :  { %2642 = vtanh.f32 %v1156_v8  ;;  %370 = vmax.xlane.f32.xlu1 %v3695_v58  ;;  %v3706_v51 = vadd.f32 %v321_v60, %v3692_v56  ;;  %v2627_v50 = vpop.eup %2626  ;;  %v3715_v28 = vadd.f32 %v320_v10, %v3701_v7 }
 0x24d   :  { %368 = vmax.xlane.f32.xlu0 %v3698_v41  ;;  %2420 = vmatprep.mubr.bf16.mxu0 %v1220_v19  ;;  %2644 = vtanh.f32 %v1157_v3 }
 0x24e   :  { %2646 = vtanh.f32 %v1158_v59  ;;  %v2629_v13 = vpop.eup %2628  ;;  %1805 = vmatpush1.bf16.msra.mxu1 %v2537_v17  ;;  %2409 = vmatpush3.bf16.xpose.msra.mxu0 %v3599_v46  ;;  %v2543_v17 = vld [vmem:[%s4337_s7 + $0x50] ss:$8 sps:$4 sm:$0xff]  }
 0x24f   :  { %2648 = vtanh.f32 %v3580_v14  ;;  %v1222_v8 = vpack.c.bf16 %v2629_v13, %v2627_v50  ;;  %2410 = vmatprep.subr.bf16.mxu0 %v3625_v45  ;;  %1806 = vmatprep.subr.bf16.mxu1 %v2542_v54  ;;  %v2546_v50 = vld [vmem:[%s4337_s7 + $0x60] ss:$8 sps:$4 sm:$0xff]   ;;  %v2548_v13 = vld [vmem:[%s4337_s7 + $0x64] ss:$8 sps:$4 sm:$0xff]  }
 0x250   :  { %v2631_v20 = vpop.eup %2630  ;;  %366 = vmax.xlane.f32.xlu1 %v3706_v51  ;;  %v2570_v54 = vld [vmem:[%s4337_s7 + $0xe0] ss:$8 sps:$4 sm:$0xff]  }
 0x251   :  { %v2633_v0 = vpop.eup %2632  ;;  %364 = vmax.xlane.f32.xlu0 %v3715_v28 }
 0x252   :  { %v2635_v14 = vpop.eup %2634  ;;  %v1223_v3 = vpack.c.bf16 %v2633_v0, %v2631_v20  ;;  %1807 = vmatpush1.bf16.msra.mxu1 %v2540_v15  ;;  %v2567_v20 = vld [vmem:[%s4337_s7 + $0xd0] ss:$8 sps:$4 sm:$0xff]   ;;  %v2572_v15 = vld [vmem:[%s4337_s7 + $0xe4] ss:$8 sps:$4 sm:$0xff]   ;;  %v2575_v0 = vld [vmem:[%s4337_s7 + $0xf4] ss:$8 sps:$4 sm:$0xff]  }
 0x253   :  { %v2637_v10 = vpop.eup %2636  ;;  %1808 = vmatprep.subr.bf16.mxu1 %v2545_v18 }
 0x254   :  { %v2639_v59 = vpop.eup %2638  ;;  %v1224_v63 = vpack.c.bf16 %v2637_v10, %v2635_v14  ;;  %v2573_v14 = vld [vmem:[%s4337_s7 + $0xf0] ss:$8 sps:$4 sm:$0xff]  }
 0x255   :  { %v2641_v6 = vpop.eup %2640 }
 0x256   :  { %v2643_v33 = vpop.eup %2642  ;;  %v1225_v55 = vpack.c.bf16 %v2641_v6, %v2639_v59  ;;  %2411 = vmatpush3.bf16.xpose.msra.mxu0 %v3625_v45  ;;  %1809 = vmatpush1.bf16.msra.mxu1 %v2543_v17 }
 0x257   :  { %v2645_v44 = vpop.eup %2644  ;;  %2412 = vmatprep.subr.bf16.mxu0 %v3654_v61  ;;  %1810 = vmatprep.subr.bf16.mxu1 %v2548_v13 }
 0x258   :  { %v2647_v16 = vpop.eup %2646  ;;  %v1226_v60 = vpack.c.bf16 %v2645_v44, %v2643_v33 }
 0x259   :  { %v2649_v29 = vpop.eup %2648 }
 0x25a   :  { %v1227_v19 = vpack.c.bf16 %v2649_v29, %v2647_v16  ;;  %1811 = vmatpush1.bf16.msra.mxu1 %v2546_v50 }
 0x25e   :  { %2413 = vmatpush3.bf16.xpose.msra.mxu0 %v3654_v61 }
 0x25f   :  { %2414 = vmatprep.subr.bf16.mxu0 %v3659_v1 }
 0x266   :  { %2415 = vmatpush3.bf16.xpose.msra.mxu0 %v3659_v1 }
 0x267   :  { %2416 = vmatprep.subr.bf16.mxu0 %v3665_v2 }
 0x26e   :  { %2417 = vmatpush3.bf16.xpose.msra.mxu0 %v3665_v2 }
 0x26f   :  { %2418 = vmatprep.subr.bf16.mxu0 %v3675_v21 }
 0x276   :  { %2419 = vmatpush3.bf16.xpose.msra.mxu0 %v3675_v21 }
 0x277   :  { %2436 = vmatprep.subr.bf16.mxu0 %v3589_v23 }
 0x27d   :  { %2421 = vmatmul.mubr.bf16.vlgmr.msra.gmra.mrb[16].mxu0 %v1221_v47  ;;  %v2564_v47 = vld [vmem:[%s4337_s7 + $0xc0] ss:$8 sps:$4 sm:$0xff]  }
 0x27e   :  { %2424 = vmatprep.mubr.bf16.mxu0 %v1222_v8  ;;  %2437 = vmatpush3.bf16.msra.mxu0 %v3589_v23  ;;  %v2561_v23 = vld [vmem:[%s4337_s7 + $0xb0] ss:$8 sps:$4 sm:$0xff]   ;;  %v2569_v8 = vld [vmem:[%s4337_s7 + $0xd4] ss:$8 sps:$4 sm:$0xff]  }
 0x27f   :  { %2438 = vmatprep.subr.bf16.mxu0 %v3597_v22 }
 0x282   :  { %2439 = vmatpush3.bf16.msra.mxu0 %v3597_v22 }
 0x283   :  { %2440 = vmatprep.subr.bf16.mxu0 %v3599_v46 }
 0x285   :  { %2425 = vmatmul.mubr.bf16.gmra.mrb[20].mxu0 %v1223_v3 }
 0x286   :  { %2428 = vmatprep.mubr.bf16.mxu0 %v1224_v63  ;;  %2441 = vmatpush3.bf16.msra.mxu0 %v3599_v46 }
 0x287   :  { %2442 = vmatprep.subr.bf16.mxu0 %v3625_v45 }
 0x28a   :  { %2443 = vmatpush3.bf16.msra.mxu0 %v3625_v45 }
 0x28b   :  { %2444 = vmatprep.subr.bf16.mxu0 %v3654_v61 }
 0x28d   :  { %2429 = vmatmul.mubr.bf16.gmra.mrb[24].mxu0 %v1225_v55 }
 0x28e   :  { %2432 = vmatprep.mubr.bf16.mxu0 %v1226_v60  ;;  %2445 = vmatpush3.bf16.msra.mxu0 %v3654_v61 }
 0x28f   :  { %2446 = vmatprep.subr.bf16.mxu0 %v3659_v1 }
 0x292   :  { %2447 = vmatpush3.bf16.msra.mxu0 %v3659_v1 }
 0x293   :  { %2448 = vmatprep.subr.bf16.mxu0 %v3665_v2  ;;  %v3832_v60 = vpop.xlane.xlu1 %344 }
 0x294   :  { %v3830_v63 = vpop.xlane.xlu0 %340 }
 0x295   :  { %2433 = vmatmul.mubr.bf16.gmra.mrb[28].mxu0 %v1227_v19 }
 0x296   :  { %2449 = vmatpush3.bf16.msra.mxu0 %v3665_v2  ;;  %2452 = vmatprep.mubr.bf16.mxu0 %v2957_v9  ;;  %v2549_v9 = vld [vmem:[%s4337_s7 + $0x70] ss:$8 sps:$4 sm:$0xff]  }
 0x297   :  { %2450 = vmatprep.subr.bf16.mxu0 %v3675_v21 }
 0x29a   :  { %2451 = vmatpush3.bf16.msra.mxu0 %v3675_v21 }
 0x29d   :  { %2453 = vmatmul.mubr.bf16.vlgmr.msra.gmra.mrb[32].mxu0 %v3048_v25  ;;  %v2551_v25 = vld [vmem:[%s4337_s7 + $0x74] ss:$8 sps:$4 sm:$0xff]  }
 0x29e   :  { %2456 = vmatprep.mubr.bf16.mxu0 %v3053_v26  ;;  %v2554_v26 = vld [vmem:[%s4337_s7 + $0x84] ss:$8 sps:$4 sm:$0xff]   ;;  %1812 = vmatprep.subr.bf16.mxu1 %v2551_v25 }
 0x29f   :  { %1813 = vmatpush1.bf16.msra.mxu1 %v2549_v9  ;;  %v343_v9 = vpop.xlane.xlu0 %342 }
 0x2a0   :  { %1814 = vmatprep.subr.bf16.mxu1 %v2554_v26 }
 0x2a5   :  { %2457 = vmatmul.mubr.bf16.gmra.mrb[36].mxu0 %v3072_v30  ;;  %v2552_v30 = vld [vmem:[%s4337_s7 + $0x80] ss:$8 sps:$4 sm:$0xff]  }
 0x2a6   :  { %2460 = vmatprep.mubr.bf16.mxu0 %v3081_v32  ;;  %1815 = vmatpush1.bf16.msra.mxu1 %v2552_v30  ;;  %v2555_v32 = vld [vmem:[%s4337_s7 + $0x90] ss:$8 sps:$4 sm:$0xff]  }
 0x2ad   :  { %2461 = vmatmul.mubr.bf16.gmra.mrb[40].mxu0 %v3100_v36  ;;  %v2557_v36 = vld [vmem:[%s4337_s7 + $0x94] ss:$8 sps:$4 sm:$0xff]  }
 0x2ae   :  { %2464 = vmatprep.mubr.bf16.mxu0 %v3108_v38  ;;  %v2560_v38 = vld [vmem:[%s4337_s7 + $0xa4] ss:$8 sps:$4 sm:$0xff]   ;;  %1816 = vmatprep.subr.bf16.mxu1 %v2557_v36  ;;  %v3845_v36 = vpop.xlane.xlu1 %346 }
 0x2af   :  { %1817 = vmatpush1.bf16.msra.mxu1 %v2555_v32 }
 0x2b0   :  { %1818 = vmatprep.subr.bf16.mxu1 %v2560_v38 }
 0x2b5   :  { %2465 = vmatmul.mubr.bf16.gmra.mrb[44].mxu0 %v3126_v42  ;;  %v2558_v42 = vld [vmem:[%s4337_s7 + $0xa0] ss:$8 sps:$4 sm:$0xff]   ;;  %s2828_s7 = smov [#allocation2]  }
 0x2b6   :  { %1819 = vmatpush1.bf16.msra.mxu1 %v2558_v42  ;;  %s2167_s23 = sshll.u32 %s2828_s7, 4  ;;  %s2168_s23 = int_to_ptr.vmem [resolvable:$true] %s2167_s23 }
 0x2b7   :  { %1820 = vmatprep.subr.bf16.mxu1 %v2563_v34  ;;  %s2780_s3 = scalar_lea.vmem %s2168_s23, 2048  ;;  %p2785_p1 = scmp.lt.s32.totalorder %s2168_s23, %s2168_s23 }
 0x2b8   :  { %p2781_p0 = scmp.ne.s32.totalorder %s2168_s23, %s2780_s3  ;;  %p2786_p2 = scmp.lt.s32.totalorder %s2780_s3, %s2780_s3 }
 0x2ba   :  { %1821 = vmatpush1.bf16.msra.mxu1 %v2561_v23  ;;  %p2787_p3 = por %p2786_p2, %p2785_p1 }
 0x2bb   :  { %1822 = vmatprep.subr.bf16.mxu1 %v2566_v43  ;;  %v3851_v43 = vpop.xlane.xlu0 %352 }
 0x2bc   :  { %p2788_p4 = pnand %p2787_p3, %p2781_p0 }
 0x2be   :  { %1823 = vmatpush1.bf16.msra.mxu1 %v2564_v47 }
 0x2bf   :  { %1824 = vmatprep.subr.bf16.mxu1 %v2569_v8 }
 0x2c2   :  { %1825 = vmatpush1.bf16.msra.mxu1 %v2567_v20 }
 0x2c3   :  { %1826 = vmatprep.subr.bf16.mxu1 %v2572_v15  ;;  %v3857_v15 = vpop.xlane.xlu1 %354 }
 0x2c6   :  { %1827 = vmatpush1.bf16.msra.mxu1 %v2570_v54 }
 0x2c7   :  { %1828 = vmatprep.subr.bf16.mxu1 %v2575_v0 }
 0x2ca   :  { %1829 = vmatpush1.bf16.msra.mxu1 %v2573_v14 }
 0x350   :  { %v2422_v3 = vpop.f32.mrb[16].mxu0 }
 0x351   :  { %v1327_v10 = vmul.f32 0.2, %v2422_v3  ;;  %v1262_v59 = vpop.f32.mrb[17].mxu0 }
 0x352   :  { %v1325_v6 = vmul.f32 0.2, %v1262_v59  ;;  %v2423_v33 = vpop.f32.mrb[18].mxu0 }
 0x353   :  { %v1343_v55 = vmax.f32 %v2422_v3, %v1327_v10  ;;  %v1328_v44 = vmul.f32 0.2, %v2423_v33  ;;  %v1265_v16 = vpop.f32.mrb[19].mxu0 }
 0x354   :  { %v1326_v29 = vmul.f32 0.2, %v1265_v16  ;;  %v1341_v19 = vmax.f32 %v1262_v59, %v1325_v6  ;;  %v349_v59 = vpop.xlane.xlu0 %348 }
 0x355   :  { %v1344_v17 = vmax.f32 %v2423_v33, %v1328_v44  ;;  %v3835_v18 = vadd.f32 %v1343_v55, %v3342_v31 }
 0x356   :  { %v1342_v50 = vmax.f32 %v1265_v16, %v1326_v29  ;;  %v3843_v32 = vadd.f32 %v1341_v19, %v3334_v62  ;;  %v372_v19 = vsub.f32 %v3346_v4, %v3830_v63  ;;  %v4380_v4 = vld [vmem:[#allocation8_spill] sm:$0xff] }
 0x357   :  { %1377 = vmax.xlane.f32.xlu0 %v3835_v18  ;;  %v3839_v13 = vadd.f32 %v1344_v17, %v3359_v48  ;;  %v374_v63 = vsub.f32 %v4380_v4, %v3832_v60  ;;  %v4383_v60 = vld [vmem:[#allocation15_spill] sm:$0xff] }
 0x358   :  { %v2426_v25 = vpop.f32.mrb[20].mxu0  ;;  %v3849_v48 = vadd.f32 %v1342_v50, %v3348_v11 }
 0x359   :  { %v1331_v26 = vmul.f32 0.2, %v2426_v25  ;;  %1379 = vmax.xlane.f32.xlu1 %v3839_v13  ;;  %v1278_v30 = vpop.f32.mrb[21].mxu0 }
 0x35a   :  { %v1329_v38 = vmul.f32 0.2, %v1278_v30  ;;  %v2427_v31 = vpop.f32.mrb[22].mxu0 }
 0x35b   :  { %v1347_v42 = vmax.f32 %v2426_v25, %v1331_v26  ;;  %v1332_v23 = vmul.f32 0.2, %v2427_v31  ;;  %v1281_v34 = vpop.f32.mrb[23].mxu0  ;;  %1373 = vmax.xlane.f32.xlu0 %v3843_v32  ;;  %v373_v25 = vsub.f32 %v3363_v53, %v343_v9 }
 0x35c   :  { %v1330_v47 = vmul.f32 0.2, %v1281_v34  ;;  %v1345_v20 = vmax.f32 %v1278_v30, %v1329_v38  ;;  %v4379_v30 = vld [vmem:[#allocation13_spill] sm:$0xff]  ;;  %v3882_v38 = vpop.xlane.xlu0 %360 }
 0x35d   :  { %v1348_v8 = vmax.f32 %v2427_v31, %v1332_v23  ;;  %1375 = vmax.xlane.f32.xlu1 %v3849_v48  ;;  %v3855_v62 = vadd.f32 %v1347_v42, %v3444_v12  ;;  %v388_v42 = vmul.f32 1.442695, %v372_v19 }
 0x35e   :  { %v1346_v54 = vmax.f32 %v1281_v34, %v1330_v47  ;;  %v3865_v10 = vadd.f32 %v1345_v20, %v3455_v57 }
 0x35f   :  { %1385 = vmax.xlane.f32.xlu0 %v3855_v62  ;;  %v3861_v0 = vadd.f32 %v1348_v8, %v3442_v24  ;;  %v351_v24 = vpop.xlane.xlu1 %350  ;;  %v4382_v8 = vld [vmem:[#allocation9_spill] sm:$0xff]  ;;  %2650 = vpow2.f32 %v388_v42 }
 0x360   :  { %v2430_v11 = vpop.f32.mrb[24].mxu0  ;;  %v3869_v16 = vadd.f32 %v1346_v54, %v3450_v27  ;;  %v375_v54 = vsub.f32 %v4382_v8, %v3845_v36  ;;  %v357_v19 = vpop.xlane.xlu0 %356 }
 0x361   :  { %v1335_v14 = vmul.f32 0.2, %v2430_v11  ;;  %1387 = vmax.xlane.f32.xlu1 %v3861_v0  ;;  %v1294_v3 = vpop.f32.mrb[25].mxu0 }
 0x362   :  { %v1333_v6 = vmul.f32 0.2, %v1294_v3  ;;  %v2431_v12 = vpop.f32.mrb[26].mxu0 }
 0x363   :  { %v1351_v33 = vmax.f32 %v2430_v11, %v1335_v14  ;;  %v1336_v55 = vmul.f32 0.2, %v2431_v12  ;;  %v1297_v44 = vpop.f32.mrb[27].mxu0  ;;  %1381 = vmax.xlane.f32.xlu0 %v3865_v10  ;;  %v3890_v53 = vpop.xlane.xlu1 %362  ;;  %v390_v11 = vmul.f32 1.442695, %v373_v25 }
 0x364   :  { %v1334_v29 = vmul.f32 0.2, %v1297_v44  ;;  %v1349_v17 = vmax.f32 %v1294_v3, %v1333_v6  ;;  %v394_v25 = vmul.f32 1.442695, %v375_v54 }
 0x365   :  { %v1352_v50 = vmax.f32 %v2431_v12, %v1336_v55  ;;  %1383 = vmax.xlane.f32.xlu1 %v3869_v16  ;;  %v3875_v57 = vadd.f32 %v1351_v33, %v3463_v35  ;;  %v4381_v35 = vld [vmem:[#allocation16_spill] sm:$0xff]  ;;  %v392_v55 = vmul.f32 1.442695, %v374_v63  ;;  %2652 = vpow2.f32 %v390_v11  ;;  %v3916_v11 = vpop.xlane.xlu0 %368 }
 0x366   :  { %v1350_v26 = vmax.f32 %v1297_v44, %v1334_v29  ;;  %v3888_v34 = vadd.f32 %v1349_v17, %v4381_v35  ;;  %v4384_v44 = vld [vmem:[#allocation14_spill] sm:$0xff] }
 0x367   :  { %1393 = vmax.xlane.f32.xlu0 %v3875_v57  ;;  %v3880_v27 = vadd.f32 %v1352_v50, %v4379_v30  ;;  %v376_v29 = vsub.f32 %v4384_v44, %v349_v59  ;;  %v4385_v30 = vld [vmem:[#allocation12_spill] sm:$0xff]  ;;  %v359_v4 = vpop.xlane.xlu1 %358  ;;  %2654 = vpow2.f32 %v392_v55  ;;  %v4386_v59 = vld [vmem:[#allocation11_spill] sm:$0xff] }
 0x368   :  { %v2434_v31 = vpop.f32.mrb[28].mxu0  ;;  %v3896_v3 = vadd.f32 %v1350_v26, %v4383_v60  ;;  %v377_v26 = vsub.f32 %v4385_v30, %v351_v24  ;;  %2656 = vpow2.f32 %v394_v25  ;;  %v4387_v24 = vld [vmem:[#allocation10_spill] sm:$0xff] }
 0x369   :  { %1395 = vmax.xlane.f32.xlu1 %v3880_v27  ;;  %v1310_v23 = vpop.f32.mrb[29].mxu0  ;;  %v1339_v9 = vmul.f32 0.2, %v2434_v31  ;;  %v396_v42 = vmul.f32 1.442695, %v376_v29 }
 0x36a   :  { %v1337_v47 = vmul.f32 0.2, %v1310_v23  ;;  %v2435_v20 = vpop.f32.mrb[30].mxu0  ;;  %v398_v8 = vmul.f32 1.442695, %v377_v26 }
 0x36b   :  { %v1313_v14 = vpop.f32.mrb[31].mxu0  ;;  %1389 = vmax.xlane.f32.xlu0 %v3888_v34  ;;  %v1340_v12 = vmul.f32 0.2, %v2435_v20  ;;  %v1355_v17 = vmax.f32 %v2434_v31, %v1339_v9  ;;  %v378_v31 = vsub.f32 %v4386_v59, %v3851_v43  ;;  %2658 = vpow2.f32 %v396_v42 }
 0x36c   :  { %v1353_v6 = vmax.f32 %v1310_v23, %v1337_v47  ;;  %v1338_v33 = vmul.f32 0.2, %v1313_v14  ;;  %2660 = vpow2.f32 %v398_v8 }
 0x36d   :  { %1391 = vmax.xlane.f32.xlu1 %v3896_v3  ;;  %v1356_v23 = vmax.f32 %v2435_v20, %v1340_v12  ;;  %v3912_v47 = vadd.f32 %v1355_v17, %v3679_v40  ;;  %v379_v20 = vsub.f32 %v4387_v24, %v3857_v15  ;;  %v400_v60 = vmul.f32 1.442695, %v378_v31  ;;  %v3924_v15 = vpop.eup %2650 }
 0x36e   :  { %v1354_v50 = vmax.f32 %v1313_v14, %v1338_v33  ;;  %v3901_v36 = vadd.f32 %v1353_v6, %v3701_v7  ;;  %v380_v40 = vsub.f32 %v3515_v5, %v357_v19  ;;  %v371_v6 = vpop.xlane.xlu1 %370  ;;  %v381_v33 = vsub.f32 %v3500_v52, %v359_v4  ;;  %v365_v19 = vpop.xlane.xlu0 %364 }
 0x36f   :  { %v3920_v43 = vadd.f32 %v1356_v23, %v3669_v39  ;;  %v402_v12 = vmul.f32 1.442695, %v379_v20  ;;  %v3931_v55 = vpop.eup %2652  ;;  %2662 = vpow2.f32 %v400_v60  ;;  %v382_v5 = vsub.f32 %v3487_v37, %v3882_v38 }
 0x370   :  { %v2454_v35 = vpop.f32.mrb[32].mxu0  ;;  %1397 = vmax.xlane.f32.xlu0 %v3901_v36  ;;  %v3906_v63 = vadd.f32 %v1354_v50, %v3692_v56  ;;  %v404_v44 = vmul.f32 1.442695, %v380_v40  ;;  %v383_v52 = vsub.f32 %v3475_v49, %v3890_v53  ;;  %v384_v23 = vsub.f32 %v3715_v28, %v365_v19 }
 0x371   :  { %v1567_v9 = vpop.f32.mrb[33].mxu0  ;;  %v3936_v50 = vpop.eup %2654  ;;  %2664 = vpow2.f32 %v402_v12  ;;  %v408_v4 = vmul.f32 1.442695, %v382_v5  ;;  %v386_v28 = vsub.f32 %v3698_v41, %v3916_v11 }
 0x372   :  { %v2455_v7 = vpop.f32.mrb[34].mxu0  ;;  %1399 = vmax.xlane.f32.xlu1 %v3906_v63  ;;  %v367_v26 = vpop.xlane.xlu1 %366  ;;  %2666 = vpow2.f32 %v404_v44  ;;  %v410_v49 = vmul.f32 1.442695, %v383_v52  ;;  %v412_v42 = vmul.f32 1.442695, %v384_v23 }
 0x373   :  { %v1631_v54 = vpack.c.bf16 %v2455_v7, %v2454_v35  ;;  %v1570_v56 = vpop.f32.mrb[35].mxu0  ;;  %v3942_v38 = vpop.eup %2656  ;;  %v385_v53 = vsub.f32 %v3706_v51, %v367_v26  ;;  %v387_v51 = vsub.f32 %v3695_v58, %v371_v6 }
 0x374   :  { %v1630_v14 = vpack.c.bf16 %v1570_v56, %v1567_v9  ;;  %1401 = vmax.xlane.f32.xlu0 %v3912_v47 }
 0x375   :  { %v3946_v35 = vpop.eup %2658  ;;  %v418_v11 = vmul.f32 1.442695, %v387_v51 }
 0x376   :  { %1831 = vmatmul.mubr.bf16.vlgmr.msra.gmra.mrb[48].mxu1 %v1630_v14  ;;  %1403 = vmax.xlane.f32.xlu1 %v3920_v43  ;;  %v3951_v31 = vpop.eup %2660  ;;  %v416_v14 = vmul.f32 1.442695, %v386_v28 }
 0x377   :  { %1840 = vmatprep.mubr.bf16.mxu1 %v3597_v22  ;;  %v406_v22 = vmul.f32 1.442695, %v381_v33 }
 0x378   :  { %420 = vadd.xlane.f32.xlu0 %v3924_v15  ;;  %v3929_v39 = vpop.f32.mrb[36].mxu0 }
 0x379   :  { %v1583_v29 = vpop.f32.mrb[37].mxu0  ;;  %2668 = vpow2.f32 %v406_v22  ;;  %v3956_v24 = vpop.eup %2662 }
 0x37a   :  { %422 = vadd.xlane.f32.xlu1 %v3931_v55  ;;  %v2459_v17 = vpop.f32.mrb[38].mxu0  ;;  %2670 = vpow2.f32 %v408_v4 }
 0x37b   :  { %v1633_v25 = vpack.c.bf16 %v2459_v17, %v3929_v39  ;;  %v1586_v30 = vpop.f32.mrb[39].mxu0  ;;  %2672 = vpow2.f32 %v410_v49  ;;  %v3960_v56 = vpop.eup %2664 }
 0x37c   :  { %424 = vadd.xlane.f32.xlu0 %v3936_v50  ;;  %v1632_v37 = vpack.c.bf16 %v1586_v30, %v1583_v29  ;;  %2674 = vpow2.f32 %v412_v42  ;;  %v3963_v41 = vpop.eup %2666 }
 0x37e   :  { %1841 = vmatmul.mubr.bf16.gmra.mrb[52].mxu1 %v1631_v54  ;;  %426 = vadd.xlane.f32.xlu1 %v3942_v38 }
 0x37f   :  { %1850 = vmatprep.mubr.bf16.mxu1 %v3599_v46  ;;  %v414_v46 = vmul.f32 1.442695, %v385_v53 }
 0x380   :  { %428 = vadd.xlane.f32.xlu0 %v3946_v35  ;;  %v2462_v59 = vpop.f32.mrb[40].mxu0 }
 0x381   :  { %v1599_v9 = vpop.f32.mrb[41].mxu0  ;;  %2676 = vpow2.f32 %v414_v46 }
 0x382   :  { %430 = vadd.xlane.f32.xlu1 %v3951_v31  ;;  %v2463_v7 = vpop.f32.mrb[42].mxu0  ;;  %2678 = vpow2.f32 %v416_v14 }
 0x383   :  { %v1635_v20 = vpack.c.bf16 %v2463_v7, %v2462_v59  ;;  %v1602_v8 = vpop.f32.mrb[43].mxu0  ;;  %v3967_v60 = vpop.eup %2668  ;;  %2680 = vpow2.f32 %v418_v11 }
 0x384   :  { %432 = vadd.xlane.f32.xlu0 %v3956_v24  ;;  %v1634_v54 = vpack.c.bf16 %v1602_v8, %v1599_v9  ;;  %v3970_v12 = vpop.eup %2670 }
 0x385   :  { %v3973_v44 = vpop.eup %2672 }
 0x386   :  { %1851 = vmatmul.mubr.bf16.gmra.mrb[56].mxu1 %v1632_v37  ;;  %434 = vadd.xlane.f32.xlu1 %v3960_v56 }
 0x387   :  { %1860 = vmatprep.mubr.bf16.mxu1 %v3625_v45  ;;  %v3976_v45 = vpop.eup %2674 }
 0x388   :  { %436 = vadd.xlane.f32.xlu0 %v3963_v41  ;;  %v2466_v58 = vpop.f32.mrb[44].mxu0 }
 0x389   :  { %v1615_v40 = vpop.f32.mrb[45].mxu0 }
 0x38a   :  { %438 = vadd.xlane.f32.xlu1 %v3967_v60  ;;  %v2467_v6 = vpop.f32.mrb[46].mxu0 }
 0x38b   :  { %v1637_v33 = vpack.c.bf16 %v2467_v6, %v2466_v58  ;;  %v1618_v39 = vpop.f32.mrb[47].mxu0  ;;  %v3980_v29 = vpop.eup %2676 }
 0x38c   :  { %440 = vadd.xlane.f32.xlu0 %v3970_v12  ;;  %v1636_v5 = vpack.c.bf16 %v1618_v39, %v1615_v40  ;;  %v3983_v19 = vpop.eup %2678 }
 0x38d   :  { %v3986_v17 = vpop.eup %2680 }
 0x38e   :  { %1861 = vmatmul.mubr.bf16.gmra.mrb[60].mxu1 %v1633_v25  ;;  %442 = vadd.xlane.f32.xlu1 %v3973_v44 }
 0x38f   :  { %1870 = vmatprep.mubr.bf16.mxu1 %v3654_v61 }
 0x390   :  { %444 = vadd.xlane.f32.xlu0 %v3976_v45 }
 0x392   :  { %446 = vadd.xlane.f32.xlu1 %v3980_v29 }
 0x394   :  { %448 = vadd.xlane.f32.xlu0 %v3983_v19 }
 0x396   :  { %1871 = vmatmul.mubr.bf16.gmra.mrb[64].mxu1 %v1634_v54  ;;  %450 = vadd.xlane.f32.xlu1 %v3986_v17 }
 0x397   :  { %1880 = vmatprep.mubr.bf16.mxu1 %v3659_v1 }
 0x39e   :  { %1881 = vmatmul.mubr.bf16.gmra.mrb[68].mxu1 %v1635_v20 }
 0x39f   :  { %1890 = vmatprep.mubr.bf16.mxu1 %v3665_v2 }
 0x3a6   :  { %1891 = vmatmul.mubr.bf16.gmra.mrb[72].mxu1 %v1636_v5 }
 0x3a7   :  { %1900 = vmatprep.mubr.bf16.mxu1 %v3675_v21 }
 0x3ae   :  { %1901 = vmatmul.mubr.bf16.gmra.mrb[76].mxu1 %v1637_v33 }
 0x3e4   :  { %v1378_v61 = vpop.xlane.xlu0 %1377 }
 0x3e5   :  { %v1407_v52 = vsub.f32 %v3835_v18, %v1378_v61 }
 0x3e6   :  { %v1380_v22 = vpop.xlane.xlu1 %1379 }
 0x3e7   :  { %v1425_v25 = vmul.f32 1.442695, %v1407_v52  ;;  %v1408_v30 = vsub.f32 %v3839_v13, %v1380_v22 }
 0x3e8   :  { %v1374_v26 = vpop.xlane.xlu0 %1373 }
 0x3e9   :  { %2682 = vpow2.f32 %v1425_v25  ;;  %v1427_v37 = vmul.f32 1.442695, %v1408_v30  ;;  %v1405_v4 = vsub.f32 %v3843_v32, %v1374_v26 }
 0x3ea   :  { %v1376_v1 = vpop.xlane.xlu1 %1375 }
 0x3eb   :  { %2684 = vpow2.f32 %v1427_v37  ;;  %v1421_v23 = vmul.f32 1.442695, %v1405_v4  ;;  %v1406_v2 = vsub.f32 %v3849_v48, %v1376_v1 }
 0x3ec   :  { %v1386_v49 = vpop.xlane.xlu0 %1385 }
 0x3ed   :  { %2686 = vpow2.f32 %v1421_v23  ;;  %v1423_v21 = vmul.f32 1.442695, %v1406_v2  ;;  %v1411_v53 = vsub.f32 %v3855_v62, %v1386_v49 }
 0x3ee   :  { %v1388_v18 = vpop.xlane.xlu1 %1387 }
 0x3ef   :  { %2688 = vpow2.f32 %v1423_v21  ;;  %v1433_v59 = vmul.f32 1.442695, %v1411_v53  ;;  %v1412_v13 = vsub.f32 %v3861_v0, %v1388_v18 }
 0x3f0   :  { %v1382_v28 = vpop.xlane.xlu0 %1381 }
 0x3f1   :  { %2690 = vpow2.f32 %v1433_v59  ;;  %v1435_v42 = vmul.f32 1.442695, %v1412_v13  ;;  %v1409_v32 = vsub.f32 %v3865_v10, %v1382_v28 }
 0x3f2   :  { %v1384_v9 = vpop.xlane.xlu1 %1383 }
 0x3f3   :  { %v3999_v7 = vpop.eup %2682  ;;  %2692 = vpow2.f32 %v1435_v42  ;;  %v1429_v48 = vmul.f32 1.442695, %v1409_v32  ;;  %v1410_v51 = vsub.f32 %v3869_v16, %v1384_v9 }
 0x3f4   :  { %1457 = vadd.xlane.f32.xlu0 %v3999_v7  ;;  %v1394_v62 = vpop.xlane.xlu0 %1393 }
 0x3f5   :  { %v4003_v46 = vpop.eup %2684  ;;  %2694 = vpow2.f32 %v1429_v48  ;;  %v1431_v20 = vmul.f32 1.442695, %v1410_v51  ;;  %v1415_v0 = vsub.f32 %v3875_v57, %v1394_v62 }
 0x3f6   :  { %v1396_v8 = vpop.xlane.xlu1 %1395  ;;  %1459 = vadd.xlane.f32.xlu1 %v4003_v46 }
 0x3f7   :  { %v4007_v10 = vpop.eup %2686  ;;  %2696 = vpow2.f32 %v1431_v20  ;;  %v1441_v54 = vmul.f32 1.442695, %v1415_v0  ;;  %v1416_v14 = vsub.f32 %v3880_v27, %v1396_v8 }
 0x3f8   :  { %1453 = vadd.xlane.f32.xlu0 %v4007_v10  ;;  %v1390_v16 = vpop.xlane.xlu0 %1389 }
 0x3f9   :  { %v4011_v11 = vpop.eup %2688  ;;  %2698 = vpow2.f32 %v1441_v54  ;;  %v1443_v58 = vmul.f32 1.442695, %v1416_v14  ;;  %v1413_v40 = vsub.f32 %v3888_v34, %v1390_v16 }
 0x3fa   :  { %v1392_v6 = vpop.xlane.xlu1 %1391  ;;  %1455 = vadd.xlane.f32.xlu1 %v4011_v11 }
 0x3fb   :  { %v4015_v57 = vpop.eup %2690  ;;  %2700 = vpow2.f32 %v1443_v58  ;;  %v1437_v33 = vmul.f32 1.442695, %v1413_v40  ;;  %v1414_v39 = vsub.f32 %v3896_v3, %v1392_v6 }
 0x3fc   :  { %1465 = vadd.xlane.f32.xlu0 %v4015_v57 }
 0x3fd   :  { %v4019_v27 = vpop.eup %2692  ;;  %2702 = vpow2.f32 %v1437_v33  ;;  %v1439_v5 = vmul.f32 1.442695, %v1414_v39  ;;  %v1398_v61 = vpop.xlane.xlu0 %1397 }
 0x3fe   :  { %v1417_v52 = vsub.f32 %v3901_v36, %v1398_v61  ;;  %1467 = vadd.xlane.f32.xlu1 %v4019_v27 }
 0x3ff   :  { %v4023_v34 = vpop.eup %2694  ;;  %2704 = vpow2.f32 %v1439_v5  ;;  %v1400_v22 = vpop.xlane.xlu1 %1399 }
 0x400   :  { %v1445_v25 = vmul.f32 1.442695, %v1417_v52  ;;  %v1418_v30 = vsub.f32 %v3906_v63, %v1400_v22  ;;  %1461 = vadd.xlane.f32.xlu0 %v4023_v34 }
 0x401   :  { %v4027_v3 = vpop.eup %2696  ;;  %v1402_v26 = vpop.xlane.xlu0 %1401 }
 0x402   :  { %2706 = vpow2.f32 %v1445_v25  ;;  %v1447_v37 = vmul.f32 1.442695, %v1418_v30  ;;  %v1419_v4 = vsub.f32 %v3912_v47, %v1402_v26  ;;  %1463 = vadd.xlane.f32.xlu1 %v4027_v3 }
 0x403   :  { %v4031_v36 = vpop.eup %2698  ;;  %v1404_v1 = vpop.xlane.xlu1 %1403 }
 0x404   :  { %2708 = vpow2.f32 %v1447_v37  ;;  %v1449_v23 = vmul.f32 1.442695, %v1419_v4  ;;  %v1420_v2 = vsub.f32 %v3920_v43, %v1404_v1  ;;  %1473 = vadd.xlane.f32.xlu0 %v4031_v36 }
 0x405   :  { %v4035_v63 = vpop.eup %2700  ;;  %v421_v49 = vpop.xlane.xlu0 %420 }
 0x406   :  { %2710 = vpow2.f32 %v1449_v23  ;;  %v1451_v21 = vmul.f32 1.442695, %v1420_v2  ;;  %1475 = vadd.xlane.f32.xlu1 %v4035_v63 }
 0x407   :  { %v4038_v53 = vpop.eup %2702  ;;  %2712 = vrcp.f32 %v421_v49  ;;  %v423_v47 = vpop.xlane.xlu1 %422 }
 0x408   :  { %2714 = vpow2.f32 %v1451_v21  ;;  %1469 = vadd.xlane.f32.xlu0 %v4038_v53 }
 0x409   :  { %v4041_v18 = vpop.eup %2704  ;;  %2716 = vrcp.f32 %v423_v47  ;;  %v425_v43 = vpop.xlane.xlu0 %424 }
 0x40a   :  { %2718 = vrcp.f32 %v425_v43  ;;  %1471 = vadd.xlane.f32.xlu1 %v4041_v18 }
 0x40b   :  { %v427_v59 = vpop.xlane.xlu1 %426 }
 0x40c   :  { %v4044_v13 = vpop.eup %2706  ;;  %2720 = vrcp.f32 %v427_v59 }
 0x40d   :  { %1477 = vadd.xlane.f32.xlu0 %v4044_v13  ;;  %v429_v28 = vpop.xlane.xlu0 %428 }
 0x40e   :  { %v4047_v42 = vpop.eup %2708  ;;  %2722 = vrcp.f32 %v429_v28 }
 0x40f   :  { %1479 = vadd.xlane.f32.xlu1 %v4047_v42  ;;  %v431_v32 = vpop.xlane.xlu1 %430 }
 0x410   :  { %v4050_v9 = vpop.eup %2710  ;;  %2724 = vrcp.f32 %v431_v32 }
 0x411   :  { %v2713_v48 = vpop.eup %2712  ;;  %1481 = vadd.xlane.f32.xlu0 %v4050_v9  ;;  %v433_v51 = vpop.xlane.xlu0 %432 }
 0x412   :  { %v4053_v62 = vpop.eup %2714  ;;  %v468_v20 = vmul.f32 %v2713_v48, %v3924_v15  ;;  %2726 = vrcp.f32 %v433_v51 }
 0x413   :  { %v2717_v0 = vpop.eup %2716  ;;  %1483 = vadd.xlane.f32.xlu1 %v4053_v62  ;;  %v435_v8 = vpop.xlane.xlu1 %434 }
 0x414   :  { %v2719_v54 = vpop.eup %2718  ;;  %484 = vst [vmem:[#allocation2] sm:$0xff] %v468_v20  ;;  %v469_v14 = vmul.f32 %v2717_v0, %v3931_v55  ;;  %2728 = vrcp.f32 %v435_v8 }
 0x415   :  { %v470_v16 = vmul.f32 %v2719_v54, %v3936_v50  ;;  %v437_v58 = vpop.xlane.xlu0 %436 }
 0x416   :  { %v2721_v40 = vpop.eup %2720  ;;  %485 = vst [vmem:[#allocation2 + $0x8] sm:$0xff] %v469_v14  ;;  %2730 = vrcp.f32 %v437_v58 }
 0x417   :  { %486 = vst [vmem:[#allocation2 + $0x10] sm:$0xff] %v470_v16  ;;  %v471_v6 = vmul.f32 %v2721_v40, %v3942_v38  ;;  %v439_v15 = vpop.xlane.xlu1 %438 }
 0x418   :  { %v2723_v33 = vpop.eup %2722  ;;  %2732 = vrcp.f32 %v439_v15 }
 0x419   :  { %487 = vst [vmem:[#allocation2 + $0x18] sm:$0xff] %v471_v6  ;;  %v472_v39 = vmul.f32 %v2723_v33, %v3946_v35  ;;  %v441_v5 = vpop.xlane.xlu0 %440 }
 0x41a   :  { %v2725_v61 = vpop.eup %2724  ;;  %2734 = vrcp.f32 %v441_v5 }
 0x41b   :  { %488 = vst [vmem:[#allocation2 + $0x20] sm:$0xff] %v472_v39  ;;  %v473_v55 = vmul.f32 %v2725_v61, %v3951_v31  ;;  %v443_v50 = vpop.xlane.xlu1 %442 }
 0x41c   :  { %v2727_v52 = vpop.eup %2726  ;;  %2736 = vrcp.f32 %v443_v50 }
 0x41d   :  { %489 = vst [vmem:[#allocation2 + $0x28] sm:$0xff] %v473_v55  ;;  %v474_v22 = vmul.f32 %v2727_v52, %v3956_v24  ;;  %v445_v25 = vpop.xlane.xlu0 %444 }
 0x41e   :  { %v2729_v38 = vpop.eup %2728  ;;  %2738 = vrcp.f32 %v445_v25 }
 0x41f   :  { %490 = vst [vmem:[#allocation2 + $0x30] sm:$0xff] %v474_v22  ;;  %v475_v30 = vmul.f32 %v2729_v38, %v3960_v56  ;;  %v447_v26 = vpop.xlane.xlu1 %446 }
 0x420   :  { %v2731_v35 = vpop.eup %2730  ;;  %2740 = vrcp.f32 %v447_v26 }
 0x421   :  { %491 = vst [vmem:[#allocation2 + $0x38] sm:$0xff] %v475_v30  ;;  %v476_v37 = vmul.f32 %v2731_v35, %v3963_v41  ;;  %v449_v4 = vpop.xlane.xlu0 %448 }
 0x422   :  { %v2733_v31 = vpop.eup %2732  ;;  %2742 = vrcp.f32 %v449_v4 }
 0x423   :  { %492 = vst [vmem:[#allocation2 + $0x40] sm:$0xff] %v476_v37  ;;  %v477_v1 = vmul.f32 %v2733_v31, %v3967_v60  ;;  %v451_v23 = vpop.xlane.xlu1 %450 }
 0x424   :  { %v2735_v24 = vpop.eup %2734  ;;  %2744 = vrcp.f32 %v451_v23 }
 0x425   :  { %493 = vst [vmem:[#allocation2 + $0x48] sm:$0xff] %v477_v1  ;;  %v478_v2 = vmul.f32 %v2735_v24, %v3970_v12 }
 0x426   :  { %v2737_v49 = vpop.eup %2736 }
 0x427   :  { %494 = vst [vmem:[#allocation2 + $0x50] sm:$0xff] %v478_v2  ;;  %v479_v56 = vmul.f32 %v2737_v49, %v3973_v44 }
 0x428   :  { %v2739_v21 = vpop.eup %2738 }
 0x429   :  { %495 = vst [vmem:[#allocation2 + $0x58] sm:$0xff] %v479_v56  ;;  %v480_v41 = vmul.f32 %v2739_v21, %v3976_v45 }
 0x42a   :  { %v2741_v47 = vpop.eup %2740 }
 0x42b   :  { %496 = vst [vmem:[#allocation2 + $0x60] sm:$0xff] %v480_v41  ;;  %v481_v43 = vmul.f32 %v2741_v47, %v3980_v29 }
 0x42c   :  { %v2743_v59 = vpop.eup %2742 }
 0x42d   :  { %497 = vst [vmem:[#allocation2 + $0x68] sm:$0xff] %v481_v43  ;;  %v482_v60 = vmul.f32 %v2743_v59, %v3983_v19 }
 0x42e   :  { %v2745_v28 = vpop.eup %2744 }
 0x42f   :  { %498 = vst [vmem:[#allocation2 + $0x70] sm:$0xff] %v482_v60  ;;  %v483_v12 = vmul.f32 %v2745_v28, %v3986_v17 }
 0x431   :  { %499 = vst [vmem:[#allocation2 + $0x78] sm:$0xff] %v483_v12 }
 0x432   :  { %2791 = shalt.err (!%p2788_p4)
}
 0x433   :  { %s2792_s24 = scalar_lea.hbm %s4343_s13, 2048 }
 0x434   :  { %p2793_p5 = scmp.ne.s32.totalorder %s4343_s13, %s2792_s24  ;;  %p2796_p6 = scmp.lt.u32.totalorder %s2792_s24, %s4343_s13 }
 0x436   :  { %p2798_p7 = pnand %p2796_p6, %p2793_p5 }
 0x438   :  { %2801 = shalt.err (!%p2798_p7)
}
 0x439   :  { %s2829_s28 = smov 128   ;;  %s2830_s29 = smov 8   ;;  %v4090_v44 = vld [vmem:[%s4338_s8] ss:$0 sm:$0xff] }
 0x43a   :  { %2173 = dma.vmem_to_hbm [thread:$0]  %s2168_s23, 2048, %s4343_s13, [#allocation3], %s2829_s28, %s2829_s28, %s2830_s29  }
 0x43b   :  { %v4095_v45 = vld [vmem:[%s4339_s9] ss:$0 sm:$0xff] }
 0x449   :  { %v1832_v29 = vpop.f32.mrb[48].mxu1 }
 0x44a   :  { %v1917_v19 = vadd.f32 %v4090_v44, %v1832_v29  ;;  %v1834_v17 = vpop.f32.mrb[49].mxu1 }
 0x44b   :  { %v1955_v32 = vadd.f32 %v4095_v45, %v1834_v17  ;;  %v1836_v48 = vpop.f32.mrb[50].mxu1 }
 0x44c   :  { %v1933_v51 = vmax.f32 %v1917_v19, 0.0  ;;  %v1918_v20 = vadd.f32 %v4090_v44, %v1836_v48  ;;  %v1838_v0 = vpop.f32.mrb[51].mxu1 }
 0x44d   :  { %v1971_v8 = vmax.f32 %v1955_v32, 0.0  ;;  %v1956_v54 = vadd.f32 %v4095_v45, %v1838_v0 }
 0x44e   :  { %v1934_v14 = vmax.f32 %v1918_v20, 0.0 }
 0x44f   :  { %v4101_v16 = vadd.f32 %v1971_v8, %v1933_v51  ;;  %v1972_v58 = vmax.f32 %v1956_v54, 0.0 }
 0x451   :  { %v4103_v40 = vadd.f32 %v1972_v58, %v1934_v14  ;;  %v1842_v6 = vpop.f32.mrb[52].mxu1  ;;  %v2025_v39 = vmul.f32 %v4101_v16, %v4101_v16 }
 0x452   :  { %v1919_v15 = vadd.f32 %v4090_v44, %v1842_v6  ;;  %v1844_v33 = vpop.f32.mrb[53].mxu1 }
 0x453   :  { %v2003_v5 = vadd.f32 %v4103_v40, %v4101_v16  ;;  %v2026_v61 = vmul.f32 %v4103_v40, %v4103_v40  ;;  %v1957_v55 = vadd.f32 %v4095_v45, %v1844_v33  ;;  %v1846_v50 = vpop.f32.mrb[54].mxu1 }
 0x454   :  { %v1935_v52 = vmax.f32 %v1919_v15, 0.0  ;;  %v1920_v22 = vadd.f32 %v4090_v44, %v1846_v50  ;;  %v1848_v25 = vpop.f32.mrb[55].mxu1 }
 0x455   :  { %v2041_v38 = vadd.f32 %v2026_v61, %v2025_v39  ;;  %v1973_v30 = vmax.f32 %v1957_v55, 0.0  ;;  %v1958_v26 = vadd.f32 %v4095_v45, %v1848_v25 }
 0x456   :  { %v1936_v35 = vmax.f32 %v1920_v22, 0.0 }
 0x457   :  { %v4115_v37 = vadd.f32 %v1973_v30, %v1935_v52  ;;  %v1974_v4 = vmax.f32 %v1958_v26, 0.0 }
 0x459   :  { %v2004_v31 = vadd.f32 %v2003_v5, %v4115_v37  ;;  %v2027_v1 = vmul.f32 %v4115_v37, %v4115_v37  ;;  %v4120_v23 = vadd.f32 %v1974_v4, %v1936_v35  ;;  %v1852_v24 = vpop.f32.mrb[56].mxu1 }
 0x45a   :  { %v1921_v2 = vadd.f32 %v4090_v44, %v1852_v24  ;;  %v1854_v49 = vpop.f32.mrb[57].mxu1 }
 0x45b   :  { %v2042_v56 = vadd.f32 %v2041_v38, %v2027_v1  ;;  %v2005_v21 = vadd.f32 %v2004_v31, %v4120_v23  ;;  %v2028_v41 = vmul.f32 %v4120_v23, %v4120_v23  ;;  %v1959_v47 = vadd.f32 %v4095_v45, %v1854_v49  ;;  %v1856_v43 = vpop.f32.mrb[58].mxu1 }
 0x45c   :  { %v1937_v59 = vmax.f32 %v1921_v2, 0.0  ;;  %v1922_v60 = vadd.f32 %v4090_v44, %v1856_v43  ;;  %v1858_v28 = vpop.f32.mrb[59].mxu1 }
 0x45d   :  { %v2043_v12 = vadd.f32 %v2042_v56, %v2028_v41  ;;  %v1975_v29 = vmax.f32 %v1959_v47, 0.0  ;;  %v1960_v19 = vadd.f32 %v4095_v45, %v1858_v28 }
 0x45e   :  { %v1938_v17 = vmax.f32 %v1922_v60, 0.0 }
 0x45f   :  { %v4129_v32 = vadd.f32 %v1975_v29, %v1937_v59  ;;  %v1976_v48 = vmax.f32 %v1960_v19, 0.0 }
 0x461   :  { %v2006_v51 = vadd.f32 %v2005_v21, %v4129_v32  ;;  %v2029_v20 = vmul.f32 %v4129_v32, %v4129_v32  ;;  %v4134_v0 = vadd.f32 %v1976_v48, %v1938_v17  ;;  %v1862_v8 = vpop.f32.mrb[60].mxu1 }
 0x462   :  { %v1923_v54 = vadd.f32 %v4090_v44, %v1862_v8  ;;  %v1864_v14 = vpop.f32.mrb[61].mxu1 }
 0x463   :  { %v2044_v58 = vadd.f32 %v2043_v12, %v2029_v20  ;;  %v2007_v6 = vadd.f32 %v2006_v51, %v4134_v0  ;;  %v2030_v15 = vmul.f32 %v4134_v0, %v4134_v0  ;;  %v1961_v33 = vadd.f32 %v4095_v45, %v1864_v14  ;;  %v1866_v39 = vpop.f32.mrb[62].mxu1 }
 0x464   :  { %v1939_v5 = vmax.f32 %v1923_v54, 0.0  ;;  %v1924_v61 = vadd.f32 %v4090_v44, %v1866_v39  ;;  %v1868_v55 = vpop.f32.mrb[63].mxu1 }
 0x465   :  { %v2045_v50 = vadd.f32 %v2044_v58, %v2030_v15  ;;  %v1977_v52 = vmax.f32 %v1961_v33, 0.0  ;;  %v1962_v22 = vadd.f32 %v4095_v45, %v1868_v55 }
 0x466   :  { %v1940_v25 = vmax.f32 %v1924_v61, 0.0 }
 0x467   :  { %v4143_v38 = vadd.f32 %v1977_v52, %v1939_v5  ;;  %v1978_v30 = vmax.f32 %v1962_v22, 0.0 }
 0x469   :  { %v2008_v26 = vadd.f32 %v2007_v6, %v4143_v38  ;;  %v2031_v35 = vmul.f32 %v4143_v38, %v4143_v38  ;;  %v4148_v4 = vadd.f32 %v1978_v30, %v1940_v25  ;;  %v1872_v31 = vpop.f32.mrb[64].mxu1 }
 0x46a   :  { %v1925_v1 = vadd.f32 %v4090_v44, %v1872_v31  ;;  %v1874_v24 = vpop.f32.mrb[65].mxu1 }
 0x46b   :  { %v2046_v2 = vadd.f32 %v2045_v50, %v2031_v35  ;;  %v2009_v49 = vadd.f32 %v2008_v26, %v4148_v4  ;;  %v2032_v56 = vmul.f32 %v4148_v4, %v4148_v4  ;;  %v1963_v21 = vadd.f32 %v4095_v45, %v1874_v24  ;;  %v1876_v41 = vpop.f32.mrb[66].mxu1 }
 0x46c   :  { %v1941_v47 = vmax.f32 %v1925_v1, 0.0  ;;  %v1926_v43 = vadd.f32 %v4090_v44, %v1876_v41  ;;  %v1878_v59 = vpop.f32.mrb[67].mxu1 }
 0x46d   :  { %v2047_v60 = vadd.f32 %v2046_v2, %v2032_v56  ;;  %v1979_v28 = vmax.f32 %v1963_v21, 0.0  ;;  %v1964_v12 = vadd.f32 %v4095_v45, %v1878_v59 }
 0x46e   :  { %v1942_v29 = vmax.f32 %v1926_v43, 0.0 }
 0x46f   :  { %v4157_v19 = vadd.f32 %v1979_v28, %v1941_v47  ;;  %v1980_v17 = vmax.f32 %v1964_v12, 0.0 }
 0x471   :  { %v2010_v48 = vadd.f32 %v2009_v49, %v4157_v19  ;;  %v2033_v51 = vmul.f32 %v4157_v19, %v4157_v19  ;;  %v4162_v20 = vadd.f32 %v1980_v17, %v1942_v29  ;;  %v1882_v8 = vpop.f32.mrb[68].mxu1 }
 0x472   :  { %v1927_v54 = vadd.f32 %v4090_v44, %v1882_v8  ;;  %v1884_v14 = vpop.f32.mrb[69].mxu1 }
 0x473   :  { %v2048_v58 = vadd.f32 %v2047_v60, %v2033_v51  ;;  %v2011_v6 = vadd.f32 %v2010_v48, %v4162_v20  ;;  %v2034_v15 = vmul.f32 %v4162_v20, %v4162_v20  ;;  %v1965_v33 = vadd.f32 %v4095_v45, %v1884_v14  ;;  %v1886_v39 = vpop.f32.mrb[70].mxu1 }
 0x474   :  { %v1943_v5 = vmax.f32 %v1927_v54, 0.0  ;;  %v1928_v61 = vadd.f32 %v4090_v44, %v1886_v39  ;;  %v1888_v55 = vpop.f32.mrb[71].mxu1 }
 0x475   :  { %v2049_v50 = vadd.f32 %v2048_v58, %v2034_v15  ;;  %v1981_v52 = vmax.f32 %v1965_v33, 0.0  ;;  %v1966_v22 = vadd.f32 %v4095_v45, %v1888_v55 }
 0x476   :  { %v1944_v25 = vmax.f32 %v1928_v61, 0.0 }
 0x477   :  { %v4171_v30 = vadd.f32 %v1981_v52, %v1943_v5  ;;  %v1982_v26 = vmax.f32 %v1966_v22, 0.0 }
 0x479   :  { %v2012_v35 = vadd.f32 %v2011_v6, %v4171_v30  ;;  %v2035_v31 = vmul.f32 %v4171_v30, %v4171_v30  ;;  %v4176_v1 = vadd.f32 %v1982_v26, %v1944_v25  ;;  %v1892_v24 = vpop.f32.mrb[72].mxu1 }
 0x47a   :  { %v1929_v2 = vadd.f32 %v4090_v44, %v1892_v24  ;;  %v1894_v49 = vpop.f32.mrb[73].mxu1 }
 0x47b   :  { %v2050_v56 = vadd.f32 %v2049_v50, %v2035_v31  ;;  %v2013_v21 = vadd.f32 %v2012_v35, %v4176_v1  ;;  %v2036_v41 = vmul.f32 %v4176_v1, %v4176_v1  ;;  %v1967_v47 = vadd.f32 %v4095_v45, %v1894_v49  ;;  %v1896_v43 = vpop.f32.mrb[74].mxu1 }
 0x47c   :  { %v1945_v59 = vmax.f32 %v1929_v2, 0.0  ;;  %v1930_v60 = vadd.f32 %v4090_v44, %v1896_v43  ;;  %v1898_v28 = vpop.f32.mrb[75].mxu1 }
 0x47d   :  { %v2051_v12 = vadd.f32 %v2050_v56, %v2036_v41  ;;  %v1983_v29 = vmax.f32 %v1967_v47, 0.0  ;;  %v1968_v17 = vadd.f32 %v4095_v45, %v1898_v28 }
 0x47e   :  { %v1946_v48 = vmax.f32 %v1930_v60, 0.0 }
 0x47f   :  { %v4185_v51 = vadd.f32 %v1983_v29, %v1945_v59  ;;  %v1984_v8 = vmax.f32 %v1968_v17, 0.0 }
 0x481   :  { %v2014_v54 = vadd.f32 %v2013_v21, %v4185_v51  ;;  %v2037_v14 = vmul.f32 %v4185_v51, %v4185_v51  ;;  %v4190_v58 = vadd.f32 %v1984_v8, %v1946_v48  ;;  %v1902_v6 = vpop.f32.mrb[76].mxu1  ;;  %v1458_v15 = vpop.xlane.xlu0 %1457 }
 0x482   :  { %v1931_v33 = vadd.f32 %v4090_v44, %v1902_v6  ;;  %2746 = vrcp.f32 %v1458_v15  ;;  %v1904_v39 = vpop.f32.mrb[77].mxu1 }
 0x483   :  { %v2052_v5 = vadd.f32 %v2051_v12, %v2037_v14  ;;  %v2015_v61 = vadd.f32 %v2014_v54, %v4190_v58  ;;  %v2038_v55 = vmul.f32 %v4190_v58, %v4190_v58  ;;  %v1969_v50 = vadd.f32 %v4095_v45, %v1904_v39  ;;  %v1906_v52 = vpop.f32.mrb[78].mxu1  ;;  %v1460_v22 = vpop.xlane.xlu1 %1459 }
 0x484   :  { %v1947_v25 = vmax.f32 %v1931_v33, 0.0  ;;  %v1932_v26 = vadd.f32 %v4090_v44, %v1906_v52  ;;  %2748 = vrcp.f32 %v1460_v22  ;;  %v1908_v35 = vpop.f32.mrb[79].mxu1 }
 0x485   :  { %v2053_v31 = vadd.f32 %v2052_v5, %v2038_v55  ;;  %v1985_v24 = vmax.f32 %v1969_v50, 0.0  ;;  %v1970_v2 = vadd.f32 %v4095_v45, %v1908_v35  ;;  %v1454_v49 = vpop.xlane.xlu0 %1453 }
 0x486   :  { %v1948_v56 = vmax.f32 %v1932_v26, 0.0  ;;  %2750 = vrcp.f32 %v1454_v49 }
 0x487   :  { %v4199_v21 = vadd.f32 %v1985_v24, %v1947_v25  ;;  %v1986_v41 = vmax.f32 %v1970_v2, 0.0  ;;  %v1456_v47 = vpop.xlane.xlu1 %1455 }
 0x488   :  { %2752 = vrcp.f32 %v1456_v47 }
 0x489   :  { %v2016_v43 = vadd.f32 %v2015_v61, %v4199_v21  ;;  %v2039_v59 = vmul.f32 %v4199_v21, %v4199_v21  ;;  %v4204_v44 = vadd.f32 %v1986_v41, %v1948_v56  ;;  %v1466_v60 = vpop.xlane.xlu0 %1465 }
 0x48a   :  { %2754 = vrcp.f32 %v1466_v60 }
 0x48b   :  { %v2054_v28 = vadd.f32 %v2053_v31, %v2039_v59  ;;  %v2017_v45 = vadd.f32 %v2016_v43, %v4204_v44  ;;  %v2040_v12 = vmul.f32 %v4204_v44, %v4204_v44  ;;  %v1468_v29 = vpop.xlane.xlu1 %1467 }
 0x48c   :  { %v2747_v17 = vpop.eup %2746  ;;  %2756 = vrcp.f32 %v1468_v29 }
 0x48d   :  { %v1503_v48 = vmul.f32 %v2747_v17, %v3999_v7  ;;  %v2018_v8 = vrot.slane %v2017_v45, 4  ;;  %v2055_v54 = vadd.f32 %v2054_v28, %v2040_v12  ;;  %v1462_v14 = vpop.xlane.xlu0 %1461 }
 0x48e   :  { %v2749_v6 = vpop.eup %2748  ;;  %2758 = vrcp.f32 %v1462_v14 }
 0x48f   :  { %1519 = vst [vmem:[#allocation4 + $0x10] sm:$0xff] %v1503_v48  ;;  %v1504_v15 = vmul.f32 %v2749_v6, %v4003_v46  ;;  %v2019_v33 = vadd.f32 %v2018_v8, %v2017_v45  ;;  %v2056_v39 = vrot.slane %v2055_v54, 4  ;;  %v1464_v5 = vpop.xlane.xlu1 %1463 }
 0x490   :  { %v2751_v61 = vpop.eup %2750  ;;  %2760 = vrcp.f32 %v1464_v5 }
 0x491   :  { %1520 = vst [vmem:[#allocation4 + $0x18] sm:$0xff] %v1504_v15  ;;  %v2020_v55 = vrot.slane %v2019_v33, 2  ;;  %v2057_v50 = vadd.f32 %v2056_v39, %v2055_v54  ;;  %v1501_v52 = vmul.f32 %v2751_v61, %v4007_v10  ;;  %v1474_v22 = vpop.xlane.xlu0 %1473 }
 0x492   :  { %v2753_v25 = vpop.eup %2752  ;;  %2762 = vrcp.f32 %v1474_v22 }
 0x493   :  { %v2021_v7 = vadd.f32 %v2020_v55, %v2019_v33  ;;  %v2058_v26 = vrot.slane %v2057_v50, 2  ;;  %1517 = vst [vmem:[#allocation4] sm:$0xff] %v1501_v52  ;;  %v1502_v35 = vmul.f32 %v2753_v25, %v4011_v11  ;;  %v1476_v31 = vpop.xlane.xlu1 %1475 }
 0x494   :  { %v2755_v46 = vpop.eup %2754  ;;  %2764 = vrcp.f32 %v1476_v31 }
 0x495   :  { %v2022_v24 = vrot.slane %v2021_v7, 1  ;;  %v2059_v2 = vadd.f32 %v2058_v26, %v2057_v50  ;;  %1518 = vst [vmem:[#allocation4 + $0x8] sm:$0xff] %v1502_v35  ;;  %v1507_v49 = vmul.f32 %v2755_v46, %v4015_v57  ;;  %v1470_v56 = vpop.xlane.xlu0 %1469 }
 0x496   :  { %v2757_v41 = vpop.eup %2756  ;;  %2766 = vrcp.f32 %v1470_v56 }
 0x497   :  { %v2023_v10 = vadd.f32 %v2022_v24, %v2021_v7  ;;  %v2060_v47 = vrot.slane %v2059_v2, 1  ;;  %1523 = vst [vmem:[#allocation4 + $0x30] sm:$0xff] %v1507_v49  ;;  %v1508_v43 = vmul.f32 %v2757_v41, %v4019_v27  ;;  %v1472_v59 = vpop.xlane.xlu1 %1471 }
 0x498   :  { %v2759_v60 = vpop.eup %2758  ;;  %2768 = vrcp.f32 %v1472_v59 }
 0x499   :  { %v4215_v11 = vmul.f32 0.0078125, %v2023_v10  ;;  %v2061_v28 = vadd.f32 %v2060_v47, %v2059_v2  ;;  %1524 = vst [vmem:[#allocation4 + $0x38] sm:$0xff] %v1508_v43  ;;  %v1505_v45 = vmul.f32 %v2759_v60, %v4023_v34 }
 0x49a   :  { %v1478_v12 = vpop.xlane.xlu0 %1477  ;;  %v2761_v48 = vpop.eup %2760 }
 0x49b   :  { %v2062_v29 = vmul.f32 0.0078125, %v2061_v28  ;;  %v2063_v57 = vmul.f32 %v4215_v11, %v4215_v11  ;;  %v2066_v17 = vsub.f32 %v4101_v16, %v4215_v11  ;;  %v2067_v27 = vsub.f32 %v4103_v40, %v4215_v11  ;;  %1521 = vst [vmem:[#allocation4 + $0x20] sm:$0xff] %v1505_v45 }
 0x49c   :  { %v2068_v8 = vsub.f32 %v4115_v37, %v4215_v11  ;;  %v2069_v54 = vsub.f32 %v4120_v23, %v4215_v11  ;;  %v2070_v34 = vsub.f32 %v4129_v32, %v4215_v11  ;;  %v2071_v14 = vsub.f32 %v4134_v0, %v4215_v11  ;;  %v2763_v6 = vpop.eup %2762 }
 0x49d   :  { %v2064_v15 = vsub.f32 %v2062_v29, %v2063_v57  ;;  %v2072_v16 = vsub.f32 %v4143_v38, %v4215_v11  ;;  %v2073_v40 = vsub.f32 %v4148_v4, %v4215_v11  ;;  %v2074_v37 = vsub.f32 %v4157_v19, %v4215_v11  ;;  %v1480_v38 = vpop.xlane.xlu1 %1479 }
 0x49e   :  { %v2765_v33 = vpop.eup %2764  ;;  %v2075_v23 = vsub.f32 %v4162_v20, %v4215_v11  ;;  %v2076_v32 = vsub.f32 %v4171_v30, %v4215_v11  ;;  %v2077_v0 = vsub.f32 %v4176_v1, %v4215_v11  ;;  %v2078_v39 = vsub.f32 %v4185_v51, %v4215_v11  ;;  %v1482_v61 = vpop.xlane.xlu0 %1481 }
 0x49f   :  { %v2065_v5 = vmax.f32 %v2064_v15, 0.0  ;;  %v2079_v4 = vsub.f32 %v4190_v58, %v4215_v11  ;;  %v2080_v19 = vsub.f32 %v4199_v21, %v4215_v11  ;;  %v2081_v20 = vsub.f32 %v4204_v44, %v4215_v11 }
 0x4a0   :  { %v2767_v55 = vpop.eup %2766  ;;  %v1506_v30 = vmul.f32 %v2761_v48, %v4027_v3  ;;  %v1511_v1 = vmul.f32 %v2763_v6, %v4031_v36  ;;  %v1512_v50 = vmul.f32 %v2765_v33, %v4035_v63  ;;  %2770 = vrcp.f32 %v1478_v12  ;;  %v2275_v12 = vld [vmem:[%s4341_s11] ss:$0 sm:$0xff] }
 0x4a1   :  { %v2082_v51 = vadd.f32 1e-05, %v2065_v5  ;;  %v1509_v52 = vmul.f32 %v2767_v55, %v4038_v53  ;;  %2772 = vrcp.f32 %v1480_v38  ;;  %v1484_v44 = vpop.xlane.xlu1 %1483 }
 0x4a2   :  { %v2769_v58 = vpop.eup %2768  ;;  %1522 = vst [vmem:[#allocation4 + $0x28] sm:$0xff] %v1506_v30  ;;  %1527 = vst [vmem:[#allocation4 + $0x50] sm:$0xff] %v1511_v1  ;;  %2774 = vrcp.f32 %v1482_v61 }
 0x4a3   :  { %1528 = vst [vmem:[#allocation4 + $0x58] sm:$0xff] %v1512_v50  ;;  %2776 = vrsqrt.f32 %v2082_v51  ;;  %1525 = vst [vmem:[#allocation4 + $0x40] sm:$0xff] %v1509_v52  ;;  %v1510_v21 = vmul.f32 %v2769_v58, %v4041_v18  ;;  %v2274_v18 = vld [vmem:[%s4340_s10] ss:$0 sm:$0xff]  ;;  %s2831_s10 = smov [#allocation4]  }
 0x4a4   :  { %2778 = vrcp.f32 %v1484_v44  ;;  %s2179_s11 = sshll.u32 %s2831_s10, 4  ;;  %s2180_s11 = int_to_ptr.vmem [resolvable:$true] %s2179_s11 }
 0x4a5   :  { %1526 = vst [vmem:[#allocation4 + $0x48] sm:$0xff] %v1510_v21  ;;  %s2802_s23 = scalar_lea.vmem %s2180_s11, 2048  ;;  %p2807_p9 = scmp.lt.s32.totalorder %s2180_s11, %s2180_s11 }
 0x4a6   :  { %p2803_p8 = scmp.ne.s32.totalorder %s2180_s11, %s2802_s23  ;;  %p2808_p10 = scmp.lt.s32.totalorder %s2802_s23, %s2802_s23 }
 0x4a8   :  { %p2809_p11 = por %p2808_p10, %p2807_p9 }
 0x4aa   :  { %v2771_v3 = vpop.eup %2770  ;;  %p2810_p12 = pnand %p2809_p11, %p2803_p8 }
 0x4ab   :  { %v2773_v36 = vpop.eup %2772  ;;  %v1513_v63 = vmul.f32 %v2771_v3, %v4044_v13 }
 0x4ac   :  { %v2775_v22 = vpop.eup %2774  ;;  %v1514_v25 = vmul.f32 %v2773_v36, %v4047_v42 }
 0x4ad   :  { %v2777_v53 = vpop.eup %2776  ;;  %1529 = vst [vmem:[#allocation4 + $0x60] sm:$0xff] %v1513_v63  ;;  %v1515_v7 = vmul.f32 %v2775_v22, %v4050_v9 }
 0x4ae   :  { %v2084_v26 = vmul.f32 %v2777_v53, %v2066_v17  ;;  %v2085_v35 = vmul.f32 %v2777_v53, %v2067_v27  ;;  %v2086_v31 = vmul.f32 %v2777_v53, %v2068_v8  ;;  %v2087_v46 = vmul.f32 %v2777_v53, %v2069_v54  ;;  %1530 = vst [vmem:[#allocation4 + $0x68] sm:$0xff] %v1514_v25 }
 0x4af   :  { %v2088_v24 = vmul.f32 %v2777_v53, %v2070_v34  ;;  %v2089_v2 = vmul.f32 %v2777_v53, %v2071_v14  ;;  %v2090_v13 = vmul.f32 %v2777_v53, %v2072_v16  ;;  %v2091_v49 = vmul.f32 %v2777_v53, %v2073_v40  ;;  %1531 = vst [vmem:[#allocation4 + $0x70] sm:$0xff] %v1515_v7 }
 0x4b0   :  { %v2092_v42 = vmul.f32 %v2777_v53, %v2074_v37  ;;  %v2093_v56 = vmul.f32 %v2777_v53, %v2075_v23  ;;  %v2094_v41 = vmul.f32 %v2777_v53, %v2076_v32  ;;  %v2095_v10 = vmul.f32 %v2777_v53, %v2077_v0  ;;  %v2779_v32 = vpop.eup %2778 }
 0x4b1   :  { %v2096_v9 = vmul.f32 %v2777_v53, %v2078_v39  ;;  %v2097_v47 = vmul.f32 %v2777_v53, %v2079_v4  ;;  %v2098_v43 = vmul.f32 %v2777_v53, %v2080_v19  ;;  %v2099_v59 = vmul.f32 %v2777_v53, %v2081_v20 }
 0x4b2   :  { %v2106_v60 = vmul.f32 %v2274_v18, %v2084_v26  ;;  %v2107_v11 = vmul.f32 %v2274_v18, %v2085_v35  ;;  %v2108_v28 = vmul.f32 %v2274_v18, %v2086_v31  ;;  %v2109_v45 = vmul.f32 %v2274_v18, %v2087_v46 }
 0x4b3   :  { %v2110_v29 = vmul.f32 %v2274_v18, %v2088_v24  ;;  %v2111_v57 = vmul.f32 %v2274_v18, %v2089_v2  ;;  %v2112_v17 = vmul.f32 %v2274_v18, %v2090_v13  ;;  %v2113_v27 = vmul.f32 %v2274_v18, %v2091_v49 }
 0x4b4   :  { %v2114_v48 = vmul.f32 %v2274_v18, %v2092_v42  ;;  %v2115_v8 = vmul.f32 %v2274_v18, %v2093_v56  ;;  %v2116_v54 = vmul.f32 %v2274_v18, %v2094_v41  ;;  %v2117_v34 = vmul.f32 %v2274_v18, %v2095_v10 }
 0x4b5   :  { %v2118_v14 = vmul.f32 %v2274_v18, %v2096_v9  ;;  %v2119_v6 = vmul.f32 %v2274_v18, %v2097_v47  ;;  %v2120_v15 = vmul.f32 %v2274_v18, %v2098_v43  ;;  %v2121_v16 = vmul.f32 %v2274_v18, %v2099_v59 }
 0x4b6   :  { %v2128_v40 = vadd.f32 %v2275_v12, %v2106_v60  ;;  %v2129_v37 = vadd.f32 %v2275_v12, %v2107_v11  ;;  %v2130_v33 = vadd.f32 %v2275_v12, %v2108_v28  ;;  %v2131_v23 = vadd.f32 %v2275_v12, %v2109_v45 }
 0x4b7   :  { %v2132_v0 = vadd.f32 %v2275_v12, %v2110_v29  ;;  %v2133_v39 = vadd.f32 %v2275_v12, %v2111_v57  ;;  %v2134_v38 = vadd.f32 %v2275_v12, %v2112_v17  ;;  %v2135_v5 = vadd.f32 %v2275_v12, %v2113_v27 }
 0x4b8   :  { %v2136_v4 = vadd.f32 %v2275_v12, %v2114_v48  ;;  %v2137_v19 = vadd.f32 %v2275_v12, %v2115_v8  ;;  %v2138_v20 = vadd.f32 %v2275_v12, %v2116_v54  ;;  %v2139_v61 = vadd.f32 %v2275_v12, %v2117_v34  ;;  %2144 = vst [vmem:[%s4342_s12] sm:$0xff] %v2128_v40 }
 0x4b9   :  { %2145 = vst [vmem:[%s4342_s12 + $0x8] sm:$0xff] %v2129_v37  ;;  %2146 = vst [vmem:[%s4342_s12 + $0x10] sm:$0xff] %v2130_v33  ;;  %v2140_v55 = vadd.f32 %v2275_v12, %v2118_v14  ;;  %v2141_v30 = vadd.f32 %v2275_v12, %v2119_v6  ;;  %v2142_v1 = vadd.f32 %v2275_v12, %v2120_v15 }
 0x4ba   :  { %2147 = vst [vmem:[%s4342_s12 + $0x18] sm:$0xff] %v2131_v23  ;;  %v2143_v50 = vadd.f32 %v2275_v12, %v2121_v16  ;;  %2148 = vst [vmem:[%s4342_s12 + $0x20] sm:$0xff] %v2132_v0  ;;  %v1516_v51 = vmul.f32 %v2779_v32, %v4053_v62 }
 0x4bb   :  { %2149 = vst [vmem:[%s4342_s12 + $0x28] sm:$0xff] %v2133_v39  ;;  %2150 = vst [vmem:[%s4342_s12 + $0x30] sm:$0xff] %v2134_v38 }
 0x4bc   :  { %2151 = vst [vmem:[%s4342_s12 + $0x38] sm:$0xff] %v2135_v5  ;;  %2152 = vst [vmem:[%s4342_s12 + $0x40] sm:$0xff] %v2136_v4 }
 0x4bd   :  { %2153 = vst [vmem:[%s4342_s12 + $0x48] sm:$0xff] %v2137_v19  ;;  %2154 = vst [vmem:[%s4342_s12 + $0x50] sm:$0xff] %v2138_v20 }
 0x4be   :  { %2155 = vst [vmem:[%s4342_s12 + $0x58] sm:$0xff] %v2139_v61  ;;  %2156 = vst [vmem:[%s4342_s12 + $0x60] sm:$0xff] %v2140_v55 }
 0x4bf   :  { %2157 = vst [vmem:[%s4342_s12 + $0x68] sm:$0xff] %v2141_v30  ;;  %2158 = vst [vmem:[%s4342_s12 + $0x70] sm:$0xff] %v2142_v1 }
 0x4c0   :  { %2159 = vst [vmem:[%s4342_s12 + $0x78] sm:$0xff] %v2143_v50  ;;  %1532 = vst [vmem:[#allocation4 + $0x78] sm:$0xff] %v1516_v51 }
 0x4c1   :  { %2813 = shalt.err (!%p2810_p12)
}
 0x4c2   :  { %s2814_s5 = scalar_lea.hbm %s4344_s14, 2048 }
 0x4c3   :  { %p2815_p13 = scmp.ne.s32.totalorder %s4344_s14, %s2814_s5  ;;  %p2818_p0 = scmp.lt.u32.totalorder %s2814_s5, %s4344_s14 }
 0x4c5   :  { %p2820_p1 = pnand %p2818_p0, %p2815_p13 }
 0x4c7   :  { %2823 = shalt.err (!%p2820_p1)
}
 0x4c8   :  { %2185 = dma.vmem_to_hbm [thread:$0]  %s2180_s11, 2048, %s4344_s14, [#allocation5], %s2829_s28, %s2829_s28, %s2830_s29  }
 0x4c9   :  { %2824 = dma.done.wait [#allocation3], 2048  }
 0x4ca   :  { %2825 = vsyncadd [#allocation3], 4294965248 }
 0x4cb   :  { %2826 = dma.done.wait [#allocation5], 2048  }
 0x4cc   :  { %2827 = vsyncadd [#allocation5], 4294965248 }
 0x4cd   :  { %2194 = vsyncpa [#allocation3], 1 }
 0x4ce   :  { %2195 = vsyncpa [#allocation5], 1 }

</bundles_post_ra>
